<compile_context>
chip_gen: v6e
topology: v6e:2x2x1
jax: 0.10.0
libtpu: 0.0.40
codegen_flags: <defaults>
</compile_context>

<pallas_src>
import numpy as np
import jax
import jax.numpy as jnp
from jax import lax
from jax.experimental import pallas as pl
from jax.experimental.pallas import tpu as pltpu

_NEG_BIG = -1e30


def _round_up(x, m):
    return ((x + m - 1) // m) * m


def _make_attention_kernel(feat):
    def kernel(kv_tbl_ref, kv_cnt_ref,                       # scalar prefetch (SMEM)
               sq_ref, skv_ref, molq_ref, molk_ref, w_ref, b_ref,  # inputs (VMEM)
               out_ref,                                      # output (VMEM)
               q_scr, acc_scr, m_scr, l_scr):                # scratch (VMEM)
        i = pl.program_id(0)
        j = pl.program_id(1)
        scale = 1.0 / float(feat) ** 0.5

        @pl.when(j == 0)
        def _init():
            # Project Q once per query tile (bf16 x bf16 -> f32 acc), fold in bias and
            # the 1/sqrt(F) scale, then cache in bf16 for the scores matmul.
            xq = sq_ref[...].astype(jnp.bfloat16)
            q = jnp.dot(xq, w_ref[:, 0:feat], preferred_element_type=jnp.float32)
            q = (q + b_ref[:, 0:feat]) * scale
            q_scr[...] = q.astype(jnp.bfloat16)
            m_scr[...] = jnp.full_like(m_scr, _NEG_BIG)
            l_scr[...] = jnp.zeros_like(l_scr)
            acc_scr[...] = jnp.zeros_like(acc_scr)

        @pl.when(j < kv_cnt_ref[i])
        def _step():
            xk = skv_ref[...].astype(jnp.bfloat16)
            k = (jnp.dot(xk, w_ref[:, feat:2 * feat],
                         preferred_element_type=jnp.float32)
                 + b_ref[:, feat:2 * feat]).astype(jnp.bfloat16)
            v = (jnp.dot(xk, w_ref[:, 2 * feat:3 * feat],
                         preferred_element_type=jnp.float32)
                 + b_ref[:, 2 * feat:3 * feat]).astype(jnp.bfloat16)

            # scores (TQ, TK), f32; contraction over the feature (lane) dim.
            s = lax.dot_general(q_scr[...], k, (((1,), (1,)), ((), ())),
                                preferred_element_type=jnp.float32)

            # Block-diagonal molecule mask (padded rows/cols carry mol-id -1).
            mask = molq_ref[...] == molk_ref[...]            # (TQ,1)==(1,TK) -> (TQ,TK)
            s = jnp.where(mask, s, _NEG_BIG)

            # Online softmax update (all f32; masked terms explicitly zeroed).
            m_prev = m_scr[...]
            m_new = jnp.maximum(m_prev, jnp.max(s, axis=-1, keepdims=True))
            p = jnp.where(mask, jnp.exp(s - m_new), 0.0)
            alpha = jnp.exp(m_prev - m_new)
            l_scr[...] = alpha * l_scr[...] + jnp.sum(p, axis=-1, keepdims=True)
            acc_scr[...] = alpha * acc_scr[...] + jnp.dot(
                p.astype(jnp.bfloat16), v, preferred_element_type=jnp.float32)
            m_scr[...] = m_new

        @pl.when(j == pl.num_programs(1) - 1)
        def _finalize():
            inv = pl.reciprocal(jnp.maximum(l_scr[...], 1e-30), approx=True)
            out_ref[...] = (acc_scr[...] * inv).astype(out_ref.dtype)

    return kernel


def nonlocal_interaction(s, num_atoms, params):
    """s: (N, F) float32 flat atom features; num_atoms: per-molecule atom counts."""
    num_atoms = np.asarray(num_atoms, dtype=np.int64)
    n_mols = int(num_atoms.shape[0])
    N, feat = s.shape
    assert feat % 128 == 0, "feat_dim must be a multiple of 128 (lane width)"

    # ---- tile sizes --------------------------------------------------------
    tk = 128
    if N <= 128:
        tq = 128
    else:
        tq = 512
        # keep >= 2 query tiles when possible so the "parallel" axis spans v7x's 2 TCs
        while tq > 128 and (N + tq - 1) // tq < 2:
            tq //= 2
    n_pad = _round_up(max(N, 1), tq)      # multiple of tq (and of tk = 128)
    n_q = n_pad // tq

    # ---- host-side metadata (tiny O(N) int arrays; no activation gathers) ---
    offsets = np.concatenate([[0], np.cumsum(num_atoms)]).astype(np.int64)
    mol_of_row = np.full((n_pad,), -1, dtype=np.int32)
    mol_of_row[:N] = np.repeat(np.arange(n_mols, dtype=np.int32), num_atoms)

    # Per query tile: contiguous range of key tiles holding its molecules.
    kv_lists = []
    for qi in range(n_q):
        lo = qi * tq
        hi = min((qi + 1) * tq, N) - 1
        m_lo = int(mol_of_row[lo])
        m_hi = int(mol_of_row[hi])
        t_lo = int(offsets[m_lo]) // tk
        t_hi = (int(offsets[m_hi + 1]) - 1) // tk
        kv_lists.append(list(range(t_lo, t_hi + 1)))
    kmax = max(len(lst) for lst in kv_lists)
    kv_tbl = np.zeros((n_q, kmax), dtype=np.int32)
    kv_cnt = np.zeros((n_q,), dtype=np.int32)
    for qi, lst in enumerate(kv_lists):
        kv_cnt[qi] = len(lst)
        kv_tbl[qi, :len(lst)] = lst
        kv_tbl[qi, len(lst):] = lst[-1]   # repeat last index -> no new DMA; skipped via pl.when
    kv_tbl_flat = jnp.asarray(kv_tbl.reshape(-1))
    kv_cnt = jnp.asarray(kv_cnt)

    # ---- device inputs (only tail padding; no per-molecule padded gather) ---
    if n_pad > N:
        s_pad = jnp.concatenate([s, jnp.zeros((n_pad - N, feat), s.dtype)], axis=0)
    else:
        s_pad = s
    mol_rows = jnp.asarray(mol_of_row.reshape(n_pad, 1))
    mol_cols = jnp.asarray(mol_of_row.reshape(1, n_pad))
    w_bf16 = jnp.asarray(params["W"]).astype(jnp.bfloat16)     # bf16 MXU operand
    b2d = jnp.asarray(params["b"], jnp.float32).reshape(1, 3 * feat)

    kernel = _make_attention_kernel(feat)

    out_pad = pl.pallas_call(
        kernel,
        out_shape=jax.ShapeDtypeStruct((n_pad, feat), s.dtype),
        grid_spec=pltpu.PrefetchScalarGridSpec(
            num_scalar_prefetch=2,
            grid=(n_q, kmax),
            in_specs=[
                pl.BlockSpec((tq, feat), lambda qi, kj, tbl, cnt: (qi, 0)),   # s (query rows)
                pl.BlockSpec((tk, feat),
                             lambda qi, kj, tbl, cnt: (tbl[qi * kmax + kj], 0)),  # s (kv rows)
                pl.BlockSpec((tq, 1), lambda qi, kj, tbl, cnt: (qi, 0)),      # mol-id (rows)
                pl.BlockSpec((1, tk),
                             lambda qi, kj, tbl, cnt: (0, tbl[qi * kmax + kj])),  # mol-id (cols)
                pl.BlockSpec((feat, 3 * feat), lambda qi, kj, tbl, cnt: (0, 0)),  # W (bf16)
                pl.BlockSpec((1, 3 * feat), lambda qi, kj, tbl, cnt: (0, 0)),     # b (f32)
            ],
            out_specs=pl.BlockSpec((tq, feat), lambda qi, kj, tbl, cnt: (qi, 0)),
            scratch_shapes=[
                pltpu.VMEM((tq, feat), jnp.bfloat16),   # cached (scaled) Q
                pltpu.VMEM((tq, feat), jnp.float32),    # output accumulator
                pltpu.VMEM((tq, 1), jnp.float32),       # running max
                pltpu.VMEM((tq, 1), jnp.float32),       # running denom
            ],
        ),
        compiler_params=pltpu.CompilerParams(
            dimension_semantics=("parallel", "arbitrary")),
    )(kv_tbl_flat, kv_cnt, s_pad, s_pad, mol_rows, mol_cols, w_bf16, b2d)

    return out_pad[:N]


def reference(s, num_atoms, params):
    """Pure numpy re-implementation of the torch forward (f64, for verification)."""
    s = np.asarray(s, dtype=np.float64)
    W = np.asarray(params["W"], dtype=np.float64)
    b = np.asarray(params["b"], dtype=np.float64)
    F = s.shape[1]
    qkv = s @ W + b
    Q, K, V = qkv[:, :F], qkv[:, F:2 * F], qkv[:, 2 * F:]
    outs, c = [], 0
    for n in num_atoms:
        q, k, v = Q[c:c + n], K[c:c + n], V[c:c + n]
        qk = (q @ k.T) / np.sqrt(F)
        qk = qk - qk.max(axis=-1, keepdims=True)
        a = np.exp(qk)
        a = a / a.sum(axis=-1, keepdims=True)
        outs.append(a @ v)
        c += n
    return np.concatenate(outs, axis=0)


if __name__ == "__main__":
    F = 128                          # feat_dim (lane-dense: multiple of 128)
    num_atoms = [3, 5, 4]            # 3 molecules, 12 atoms total
    N = int(sum(num_atoms))

    key = jax.random.PRNGKey(0)
    k1, k2, k3 = jax.random.split(key, 3)
    params = {
        "W": 0.1 * jax.random.normal(k1, (F, 3 * F), jnp.float32),
        "b": 0.1 * jax.random.normal(k2, (3 * F,), jnp.float32),
    }
    s = jax.random.normal(k3, (N, F), jnp.float32)

    out = jax.block_until_ready(nonlocal_interaction(s, num_atoms, params))
    ref = reference(s, num_atoms, params)
    # Tolerance reflects bf16 MXU operands (projection, QK^T, PV) with f32 accumulation
    # and the approx reciprocal in the softmax normalization.
    np.testing.assert_allclose(np.asarray(out), ref, rtol=3e-2, atol=3e-2)
    print("KERNEL_OK")
</pallas_src>

<mosaic_0001>
module attributes {stable_mosaic.version = 11 : i64} {
  func.func @kernel(%arg0: i32, %arg1: i32, %arg2: memref<1xi32, #tpu.memory_space<smem>>, %arg3: memref<1xi32, #tpu.memory_space<smem>>, %arg4: memref<128x128xf32, #tpu.memory_space<vmem>>, %arg5: memref<128x128xf32, #tpu.memory_space<vmem>>, %arg6: memref<128x1xi32, #tpu.memory_space<vmem>>, %arg7: memref<1x128xi32, #tpu.memory_space<vmem>>, %arg8: memref<128x384xbf16, #tpu.memory_space<vmem>>, %arg9: memref<1x384xf32, #tpu.memory_space<vmem>>, %arg10: memref<128x128xf32, #tpu.memory_space<vmem>>, %arg11: memref<128x128xbf16, #tpu.memory_space<vmem>>, %arg12: memref<128x128xf32, #tpu.memory_space<vmem>>, %arg13: memref<128x1xf32, #tpu.memory_space<vmem>>, %arg14: memref<128x1xf32, #tpu.memory_space<vmem>>) attributes {dimension_semantics = [#tpu.dimension_semantics<parallel>, #tpu.dimension_semantics<arbitrary>], iteration_bounds = array<i64: 1, 1>, scalar_prefetch = 2 : i64, scratch_operands = 4 : i64, tpu.core_type = #tpu.core_type<tc>, window_params = [{transform_indices = @transform_0, window_bounds = array<i64: 128, 128>}, {transform_indices = @transform_1, window_bounds = array<i64: 128, 128>}, {transform_indices = @transform_2, window_bounds = array<i64: 128, 1>}, {transform_indices = @transform_3, window_bounds = array<i64: 1, 128>}, {pipeline_mode = #tpu.pipeline_mode<synchronous>, transform_indices = @transform_4, window_bounds = array<i64: 128, 384>}, {pipeline_mode = #tpu.pipeline_mode<synchronous>, transform_indices = @transform_5, window_bounds = array<i64: 1, 384>}, {transform_indices = @transform_6, window_bounds = array<i64: 128, 128>}]} {
    %c0_i32 = arith.constant 0 : i32
    %0 = arith.cmpi eq, %arg1, %c0_i32 : i32
    %1 = arith.extui %0 : i1 to i32
    %c0_i32_0 = arith.constant 0 : i32
    %2 = arith.cmpi ne, %1, %c0_i32_0 : i32
    scf.if %2 {
      %c0 = arith.constant 0 : index
      %c0_4 = arith.constant 0 : index
      %11 = vector.load %arg4[%c0, %c0_4] : memref<128x128xf32, #tpu.memory_space<vmem>>, vector<128x128xf32>
      %12 = arith.truncf %11 : vector<128x128xf32> to vector<128x128xbf16>
      %c0_5 = arith.constant 0 : index
      %c0_6 = arith.constant 0 : index
      %13 = vector.load %arg8[%c0_5, %c0_6] : memref<128x384xbf16, #tpu.memory_space<vmem>>, vector<128x128xbf16>
      %cst = arith.constant dense<0.000000e+00> : vector<128x128xf32>
      %14 = tpu.matmul %12, %13, %cst {dimension_numbers = #tpu.dot_dimension_numbers<[1], [0], [0], [1], [0, 0, 1, 1], [], []>} : vector<128x128xbf16>, vector<128x128xbf16>, vector<128x128xf32> -> vector<128x128xf32>
      %c0_7 = arith.constant 0 : index
      %c0_8 = arith.constant 0 : index
      %15 = vector.load %arg9[%c0_7, %c0_8] : memref<1x384xf32, #tpu.memory_space<vmem>>, vector<1x128xf32>
      %16 = vector.broadcast %15 : vector<1x128xf32> to vector<128x128xf32>
      %17 = arith.addf %14, %16 : vector<128x128xf32>
      %cst_9 = arith.constant 0.0883883461 : f32
      %18 = vector.broadcast %cst_9 : f32 to vector<128x128xf32>
      %19 = arith.mulf %17, %18 : vector<128x128xf32>
      %20 = arith.truncf %19 : vector<128x128xf32> to vector<128x128xbf16>
      %c0_10 = arith.constant 0 : index
      %c0_11 = arith.constant 0 : index
      %21 = vector.load %arg11[%c0_10, %c0_11] : memref<128x128xbf16, #tpu.memory_space<vmem>>, vector<128x128xbf16>
      tpu.vector_store %arg11[%c0_10, %c0_11], %20 {strides = array<i32>} : memref<128x128xbf16, #tpu.memory_space<vmem>>, vector<128x128xbf16>,
      %cst_12 = arith.constant -1.000000e+30 : f32
      %22 = vector.broadcast %cst_12 : f32 to vector<128x1xf32>
      %c0_13 = arith.constant 0 : index
      %c0_14 = arith.constant 0 : index
      %23 = vector.load %arg13[%c0_13, %c0_14] : memref<128x1xf32, #tpu.memory_space<vmem>>, vector<128x1xf32>
      tpu.vector_store %arg13[%c0_13, %c0_14], %22 {strides = array<i32>} : memref<128x1xf32, #tpu.memory_space<vmem>>, vector<128x1xf32>,
      %cst_15 = arith.constant 0.000000e+00 : f32
      %24 = vector.broadcast %cst_15 : f32 to vector<128x1xf32>
      %c0_16 = arith.constant 0 : index
      %c0_17 = arith.constant 0 : index
      %25 = vector.load %arg14[%c0_16, %c0_17] : memref<128x1xf32, #tpu.memory_space<vmem>>, vector<128x1xf32>
      tpu.vector_store %arg14[%c0_16, %c0_17], %24 {strides = array<i32>} : memref<128x1xf32, #tpu.memory_space<vmem>>, vector<128x1xf32>,
      %cst_18 = arith.constant 0.000000e+00 : f32
      %26 = vector.broadcast %cst_18 : f32 to vector<128x128xf32>
      %c0_19 = arith.constant 0 : index
      %c0_20 = arith.constant 0 : index
      %27 = vector.load %arg12[%c0_19, %c0_20] : memref<128x128xf32, #tpu.memory_space<vmem>>, vector<128x128xf32>
      tpu.vector_store %arg12[%c0_19, %c0_20], %26 {strides = array<i32>} : memref<128x128xf32, #tpu.memory_space<vmem>>, vector<128x128xf32>,
    } else {
    }
    %3 = arith.index_cast %arg0 : i32 to index
    %4 = memref.load %arg3[%3] : memref<1xi32, #tpu.memory_space<smem>>
    %5 = arith.cmpi slt, %arg1, %4 : i32
    %6 = arith.extui %5 : i1 to i32
    %c0_i32_1 = arith.constant 0 : i32
    %7 = arith.cmpi ne, %6, %c0_i32_1 : i32
    scf.if %7 {
      %c0 = arith.constant 0 : index
      %c0_4 = arith.constant 0 : index
      %11 = vector.load %arg5[%c0, %c0_4] : memref<128x128xf32, #tpu.memory_space<vmem>>, vector<128x128xf32>
      %12 = arith.truncf %11 : vector<128x128xf32> to vector<128x128xbf16>
      %c0_5 = arith.constant 0 : index
      %c128 = arith.constant 128 : index
      %13 = vector.load %arg8[%c0_5, %c128] : memref<128x384xbf16, #tpu.memory_space<vmem>>, vector<128x128xbf16>
      %cst = arith.constant dense<0.000000e+00> : vector<128x128xf32>
      %14 = tpu.matmul %12, %13, %cst {dimension_numbers = #tpu.dot_dimension_numbers<[1], [0], [0], [1], [0, 0, 1, 1], [], []>} : vector<128x128xbf16>, vector<128x128xbf16>, vector<128x128xf32> -> vector<128x128xf32>
      %c0_6 = arith.constant 0 : index
      %c128_7 = arith.constant 128 : index
      %15 = vector.load %arg9[%c0_6, %c128_7] : memref<1x384xf32, #tpu.memory_space<vmem>>, vector<1x128xf32>
      %16 = vector.broadcast %15 : vector<1x128xf32> to vector<128x128xf32>
      %17 = arith.addf %14, %16 : vector<128x128xf32>
      %18 = arith.truncf %17 : vector<128x128xf32> to vector<128x128xbf16>
      %c0_8 = arith.constant 0 : index
      %c256 = arith.constant 256 : index
      %19 = vector.load %arg8[%c0_8, %c256] : memref<128x384xbf16, #tpu.memory_space<vmem>>, vector<128x128xbf16>
      %cst_9 = arith.constant dense<0.000000e+00> : vector<128x128xf32>
      %20 = tpu.matmul %12, %19, %cst_9 {dimension_numbers = #tpu.dot_dimension_numbers<[1], [0], [0], [1], [0, 0, 1, 1], [], []>} : vector<128x128xbf16>, vector<128x128xbf16>, vector<128x128xf32> -> vector<128x128xf32>
      %c0_10 = arith.constant 0 : index
      %c256_11 = arith.constant 256 : index
      %21 = vector.load %arg9[%c0_10, %c256_11] : memref<1x384xf32, #tpu.memory_space<vmem>>, vector<1x128xf32>
      %22 = vector.broadcast %21 : vector<1x128xf32> to vector<128x128xf32>
      %23 = arith.addf %20, %22 : vector<128x128xf32>
      %24 = arith.truncf %23 : vector<128x128xf32> to vector<128x128xbf16>
      %c0_12 = arith.constant 0 : index
      %c0_13 = arith.constant 0 : index
      %25 = vector.load %arg11[%c0_12, %c0_13] : memref<128x128xbf16, #tpu.memory_space<vmem>>, vector<128x128xbf16>
      %cst_14 = arith.constant dense<0.000000e+00> : vector<128x128xf32>
      %26 = tpu.matmul %25, %18, %cst_14 {dimension_numbers = #tpu.dot_dimension_numbers<[1], [1], [0], [0], [0, 0, 1, 0], [], []>} : vector<128x128xbf16>, vector<128x128xbf16>, vector<128x128xf32> -> vector<128x128xf32>
      %c0_15 = arith.constant 0 : index
      %c0_16 = arith.constant 0 : index
      %27 = vector.load %arg6[%c0_15, %c0_16] : memref<128x1xi32, #tpu.memory_space<vmem>>, vector<128x1xi32>
      %c0_17 = arith.constant 0 : index
      %c0_18 = arith.constant 0 : index
      %28 = vector.load %arg7[%c0_17, %c0_18] : memref<1x128xi32, #tpu.memory_space<vmem>>, vector<1x128xi32>
      %29 = vector.broadcast %27 : vector<128x1xi32> to vector<128x128xi32>
      %30 = vector.broadcast %28 : vector<1x128xi32> to vector<128x128xi32>
      %31 = arith.cmpi eq, %29, %30 : vector<128x128xi32>
      %cst_19 = arith.constant -1.000000e+30 : f32
      %32 = vector.broadcast %cst_19 : f32 to vector<128x128xf32>
      %33 = arith.select %31, %26, %32 : vector<128x128xi1>, vector<128x128xf32>
      %c0_20 = arith.constant 0 : index
      %c0_21 = arith.constant 0 : index
      %34 = vector.load %arg13[%c0_20, %c0_21] : memref<128x1xf32, #tpu.memory_space<vmem>>, vector<128x1xf32>
      %cst_22 = arith.constant dense<0xFF800000> : vector<128xf32>
      %35 = vector.multi_reduction <maximumf>, %33, %cst_22 [1] : vector<128x128xf32> to vector<128xf32>
      %36 = vector.shape_cast %35 : vector<128xf32> to vector<128x1xf32>
      %37 = arith.maximumf %34, %36 : vector<128x1xf32>
      %38 = vector.broadcast %37 : vector<128x1xf32> to vector<128x128xf32>
      %39 = arith.subf %33, %38 : vector<128x128xf32>
      %40 = math.exp %39 : vector<128x128xf32>
      %cst_23 = arith.constant 0.000000e+00 : f32
      %41 = vector.broadcast %cst_23 : f32 to vector<128x128xf32>
      %42 = arith.select %31, %40, %41 : vector<128x128xi1>, vector<128x128xf32>
      %43 = arith.subf %34, %37 : vector<128x1xf32>
      %44 = math.exp %43 : vector<128x1xf32>
      %c0_24 = arith.constant 0 : index
      %c0_25 = arith.constant 0 : index
      %45 = vector.load %arg14[%c0_24, %c0_25] : memref<128x1xf32, #tpu.memory_space<vmem>>, vector<128x1xf32>
      %46 = arith.mulf %44, %45 : vector<128x1xf32>
      %cst_26 = arith.constant dense<0.000000e+00> : vector<128xf32>
      %47 = vector.multi_reduction <add>, %42, %cst_26 [1] : vector<128x128xf32> to vector<128xf32>
      %48 = vector.shape_cast %47 : vector<128xf32> to vector<128x1xf32>
      %49 = arith.addf %46, %48 : vector<128x1xf32>
      %c0_27 = arith.constant 0 : index
      %c0_28 = arith.constant 0 : index
      %50 = vector.load %arg14[%c0_27, %c0_28] : memref<128x1xf32, #tpu.memory_space<vmem>>, vector<128x1xf32>
      tpu.vector_store %arg14[%c0_27, %c0_28], %49 {strides = array<i32>} : memref<128x1xf32, #tpu.memory_space<vmem>>, vector<128x1xf32>,
      %c0_29 = arith.constant 0 : index
      %c0_30 = arith.constant 0 : index
      %51 = vector.load %arg12[%c0_29, %c0_30] : memref<128x128xf32, #tpu.memory_space<vmem>>, vector<128x128xf32>
      %52 = vector.broadcast %44 : vector<128x1xf32> to vector<128x128xf32>
      %53 = arith.mulf %52, %51 : vector<128x128xf32>
      %54 = arith.truncf %42 : vector<128x128xf32> to vector<128x128xbf16>
      %cst_31 = arith.constant dense<0.000000e+00> : vector<128x128xf32>
      %55 = tpu.matmul %54, %24, %cst_31 {dimension_numbers = #tpu.dot_dimension_numbers<[1], [0], [0], [1], [0, 0, 1, 1], [], []>} : vector<128x128xbf16>, vector<128x128xbf16>, vector<128x128xf32> -> vector<128x128xf32>
      %56 = arith.addf %53, %55 : vector<128x128xf32>
      %c0_32 = arith.constant 0 : index
      %c0_33 = arith.constant 0 : index
      %57 = vector.load %arg12[%c0_32, %c0_33] : memref<128x128xf32, #tpu.memory_space<vmem>>, vector<128x128xf32>
      tpu.vector_store %arg12[%c0_32, %c0_33], %56 {strides = array<i32>} : memref<128x128xf32, #tpu.memory_space<vmem>>, vector<128x128xf32>,
      %c0_34 = arith.constant 0 : index
      %c0_35 = arith.constant 0 : index
      %58 = vector.load %arg13[%c0_34, %c0_35] : memref<128x1xf32, #tpu.memory_space<vmem>>, vector<128x1xf32>
      tpu.vector_store %arg13[%c0_34, %c0_35], %37 {strides = array<i32>} : memref<128x1xf32, #tpu.memory_space<vmem>>, vector<128x1xf32>,
    } else {
    }
    %c0_i32_2 = arith.constant 0 : i32
    %8 = arith.cmpi eq, %arg1, %c0_i32_2 : i32
    %9 = arith.extui %8 : i1 to i32
    %c0_i32_3 = arith.constant 0 : i32
    %10 = arith.cmpi ne, %9, %c0_i32_3 : i32
    scf.if %10 {
      %c0 = arith.constant 0 : index
      %c0_4 = arith.constant 0 : index
      %11 = vector.load %arg14[%c0, %c0_4] : memref<128x1xf32, #tpu.memory_space<vmem>>, vector<128x1xf32>
      %cst = arith.constant 1.000000e-30 : f32
      %12 = vector.broadcast %cst : f32 to vector<128x1xf32>
      %13 = arith.maximumf %11, %12 : vector<128x1xf32>
      %14 = tpu.reciprocal %13 {approx = true} : vector<128x1xf32> -> vector<128x1xf32>
      %c0_5 = arith.constant 0 : index
      %c0_6 = arith.constant 0 : index
      %15 = vector.load %arg12[%c0_5, %c0_6] : memref<128x128xf32, #tpu.memory_space<vmem>>, vector<128x128xf32>
      %16 = vector.broadcast %14 : vector<128x1xf32> to vector<128x128xf32>
      %17 = arith.mulf %15, %16 : vector<128x128xf32>
      %c0_7 = arith.constant 0 : index
      %c0_8 = arith.constant 0 : index
      %18 = vector.load %arg10[%c0_7, %c0_8] : memref<128x128xf32, #tpu.memory_space<vmem>>, vector<128x128xf32>
      tpu.vector_store %arg10[%c0_7, %c0_8], %17 {strides = array<i32>} : memref<128x128xf32, #tpu.memory_space<vmem>>, vector<128x128xf32>,
    } else {
    }
    return
  }
  func.func @transform_0(%arg0: i32, %arg1: i32, %arg2: memref<1xi32, #tpu.memory_space<smem>>, %arg3: memref<1xi32, #tpu.memory_space<smem>>) -> (i32, i32) {
    %c0_i32 = arith.constant 0 : i32
    %c0_i32_0 = arith.constant 0 : i32
    return %arg0, %c0_i32 : i32, i32
  }
  func.func @transform_1(%arg0: i32, %arg1: i32, %arg2: memref<1xi32, #tpu.memory_space<smem>>, %arg3: memref<1xi32, #tpu.memory_space<smem>>) -> (i32, i32) {
    %c1_i32 = arith.constant 1 : i32
    %0 = arith.muli %arg0, %c1_i32 : i32
    %1 = arith.addi %0, %arg1 : i32
    %2 = arith.index_cast %1 : i32 to index
    %3 = memref.load %arg2[%2] : memref<1xi32, #tpu.memory_space<smem>>
    %c0_i32 = arith.constant 0 : i32
    %c0_i32_0 = arith.constant 0 : i32
    return %3, %c0_i32 : i32, i32
  }
  func.func @transform_2(%arg0: i32, %arg1: i32, %arg2: memref<1xi32, #tpu.memory_space<smem>>, %arg3: memref<1xi32, #tpu.memory_space<smem>>) -> (i32, i32) {
    %c0_i32 = arith.constant 0 : i32
    %c0_i32_0 = arith.constant 0 : i32
    return %arg0, %c0_i32 : i32, i32
  }
  func.func @transform_3(%arg0: i32, %arg1: i32, %arg2: memref<1xi32, #tpu.memory_space<smem>>, %arg3: memref<1xi32, #tpu.memory_space<smem>>) -> (i32, i32) {
    %c1_i32 = arith.constant 1 : i32
    %0 = arith.muli %arg0, %c1_i32 : i32
    %1 = arith.addi %0, %arg1 : i32
    %2 = arith.index_cast %1 : i32 to index
    %3 = memref.load %arg2[%2] : memref<1xi32, #tpu.memory_space<smem>>
    %c0_i32 = arith.constant 0 : i32
    %c0_i32_0 = arith.constant 0 : i32
    return %c0_i32, %3 : i32, i32
  }
  func.func @transform_4(%arg0: i32, %arg1: i32, %arg2: memref<1xi32, #tpu.memory_space<smem>>, %arg3: memref<1xi32, #tpu.memory_space<smem>>) -> (i32, i32) {
    %c0_i32 = arith.constant 0 : i32
    %c0_i32_0 = arith.constant 0 : i32
    %c0_i32_1 = arith.constant 0 : i32
    return %c0_i32, %c0_i32_0 : i32, i32
  }
  func.func @transform_5(%arg0: i32, %arg1: i32, %arg2: memref<1xi32, #tpu.memory_space<smem>>, %arg3: memref<1xi32, #tpu.memory_space<smem>>) -> (i32, i32) {
    %c0_i32 = arith.constant 0 : i32
    %c0_i32_0 = arith.constant 0 : i32
    %c0_i32_1 = arith.constant 0 : i32
    return %c0_i32, %c0_i32_0 : i32, i32
  }
  func.func @transform_6(%arg0: i32, %arg1: i32, %arg2: memref<1xi32, #tpu.memory_space<smem>>, %arg3: memref<1xi32, #tpu.memory_space<smem>>) -> (i32, i32) {
    %c0_i32 = arith.constant 0 : i32
    %c0_i32_0 = arith.constant 0 : i32
    return %arg0, %c0_i32 : i32, i32
  }
}

</mosaic_0001>

<bundles_post_ra>
// kernel: tpu_custom_call.1
= control target key start
LH: loop header
LB: loop body
LE: loop exit
PB: predicated region body
PF: predicated region fallthrough
CT: control target
= control target key end

     0   :  { %15 = vsyncpa [#allocation10], 0  ;;  %s3271_s0 = inlined_call_operand.<no memory space> [shape: s32[1], index: 0, kind: input, shape index: {}]   ;;  %s3272_s1 = inlined_call_operand.<no memory space> [shape: s32[1], index: 1, kind: input, shape index: {}]   ;;  %s3273_s2 = inlined_call_operand.vmem [shape: f32[128,128], index: 2, kind: input, shape index: {}]   ;;  %s3274_s3 = inlined_call_operand.hbm [shape: f32[128,128], index: 3, kind: input, shape index: {}]   ;;  %s3275_s4 = inlined_call_operand.vmem [shape: s32[128,1], index: 4, kind: input, shape index: {}]   ;;  %s3276_s5 = inlined_call_operand.vmem [shape: s32[1,128], index: 5, kind: input, shape index: {}]   ;;  %s3277_s6 = inlined_call_operand.hbm [shape: bf16[128,384], index: 6, kind: input, shape index: {}]   ;;  %s3278_s7 = inlined_call_operand.vmem [shape: f32[1,384], index: 7, kind: input, shape index: {}]   ;;  %s3279_s8 = inlined_call_operand.hbm [shape: f32[128,128], index: 8, kind: output, shape index: {}]  }
   0x1   :  { %16 = vsyncpa [#allocation13], 0 }
   0x2   :  { %17 = vsyncpa [#allocation11], 0  ;;  %s1968_s29 = sshll.u32 %s3271_s0, 11  ;;  %s2499_s11 = smov [#allocation9]  }
   0x3   :  { %s29_s10 = scalar_lea.hbm %s3274_s3, %s1968_s29  ;;  %s30_s12 = sshll.u32 %s2499_s11, 4  ;;  %s31_s12 = int_to_ptr.vmem [resolvable:$true] %s30_s12 }
   0x4   :  { %s2431_s13 = scalar_lea.hbm %s29_s10, 2048  ;;  %s2433_s16 = scalar_lea.hbm %s3274_s3, 2048 }
   0x5   :  { %p2432_p0 = scmp.ne.s32.totalorder %s29_s10, %s2431_s13  ;;  %p2434_p1 = scmp.lt.s32.totalorder %s29_s10, %s3274_s3 }
   0x6   :  { %p2435_p2 = scmp.lt.s32.totalorder %s2433_s16, %s2431_s13 }
   0x8   :  { %p2436_p3 = por %p2435_p2, %p2434_p1 }
   0xa   :  { %p2437_p4 = pnand %p2436_p3, %p2432_p0 }
   0xc   :  { %2440 = shalt.err (!%p2437_p4)
}
   0xd   :  { %s2441_s19 = scalar_lea.vmem %s31_s12, 2048  ;;  %p2446_p6 = scmp.lt.s32.totalorder %s31_s12, %s31_s12 }
   0xe   :  { %p2442_p5 = scmp.ne.s32.totalorder %s31_s12, %s2441_s19  ;;  %p2447_p7 = scmp.lt.s32.totalorder %s2441_s19, %s2441_s19 }
  0x10   :  { %p2448_p8 = por %p2447_p7, %p2446_p6 }
  0x12   :  { %p2449_p9 = pnand %p2448_p8, %p2442_p5 }
  0x14   :  { %2452 = shalt.err (!%p2449_p9)
}
  0x15   :  { %s2500_s20 = smov 128   ;;  %s2501_s21 = smov 8  }
  0x16   :  { %36 = dma.hbm_to_vmem [thread:$0]  %s29_s10, 2048, %s31_s12, [#allocation10], %s2500_s20, %s2500_s20, %s2501_s21  }
  0x17   :  { %s2502_s22 = smov [#allocation12]  }
  0x18   :  { %s53_s23 = sshll.u32 %s2502_s22, 4  ;;  %s54_s23 = int_to_ptr.vmem [resolvable:$true] %s53_s23 }
  0x19   :  { %s2461_s3 = scalar_lea.vmem %s54_s23, 3072  ;;  %p2466_p11 = scmp.lt.s32.totalorder %s54_s23, %s54_s23 }
  0x1a   :  { %p2462_p10 = scmp.ne.s32.totalorder %s54_s23, %s2461_s3  ;;  %p2467_p12 = scmp.lt.s32.totalorder %s2461_s3, %s2461_s3 }
  0x1c   :  { %p2468_p13 = por %p2467_p12, %p2466_p11 }
  0x1e   :  { %p2469_p0 = pnand %p2468_p13, %p2462_p10 }
  0x20   :  { %2472 = shalt.err (!%p2469_p0)
}
  0x21   :  { %s2503_s24 = smov 192   ;;  %s2504_s25 = smov 12  }
  0x22   :  { %59 = dma.hbm_to_vmem [thread:$0]  %s3277_s6, 3072, %s54_s23, [#allocation13], %s2503_s24, %s2503_s24, %s2504_s25  }
  0x23   :  { %2493 = dma.done.wait [#allocation10], 2048  }
  0x24   :  { %2494 = vsyncadd [#allocation10], 4294965248 }
  0x25   :  { %2495 = dma.done.wait [#allocation13], 3072  }
  0x26   :  { %2496 = vsyncadd [#allocation13], 4294964224  ;;  %vm3282_vm0 = vcmask 7168   ;;  %v2505_v0 = vmov -1e+30   ;;  %v2506_v1 = vmov 0.0  }
  0x27   :  { %377 = vst.msk [vmem:[#allocation4] sm:$0xff] %vm3282_vm0, %v2505_v0  ;;  %378 = vst.msk [vmem:[#allocation4 + $0x8] sm:$0xff] %vm3282_vm0, %v2505_v0  ;;  %p78_p1 = scmp.lt.s32.totalorder %s3271_s0, 0  ;;  %v2299_v2 = vld [vmem:[#allocation12 + $0xa8] ss:$12 sps:$4 sm:$0xff]   ;;  %v88_v6 = vld [vmem:[%s3273_s2] sm:$0xff] }
  0x28   :  { %379 = vst.msk [vmem:[#allocation4 + $0x10] sm:$0xff] %vm3282_vm0, %v2505_v0  ;;  %380 = vst.msk [vmem:[#allocation4 + $0x18] sm:$0xff] %vm3282_vm0, %v2505_v0  ;;  %v2300_v3 = vld [vmem:[#allocation12 + $0x90] ss:$12 sps:$4 sm:$0xff]   ;;  %2112 = vmatprep.subr.bf16.mxu0 %v2299_v2  ;;  %2272 = vmatprep.subr.bf16.mxu1 %v2299_v2  ;;  %v2301_v4 = vld [vmem:[#allocation12 + $0x78] ss:$12 sps:$4 sm:$0xff]  }
  0x29   :  { %381 = vst.msk [vmem:[#allocation4 + $0x20] sm:$0xff] %vm3282_vm0, %v2505_v0  ;;  %382 = vst.msk [vmem:[#allocation4 + $0x28] sm:$0xff] %vm3282_vm0, %v2505_v0  ;;  %s3306_s0 = smov (!%p78_p1, %s3271_s0), 0  ;;  %2113 = vmatpush3.bf16.msra.mxu0 %v2299_v2  ;;  %2280 = vmatpush3.bf16.msra.mxu1 %v2299_v2  ;;  %v2302_v5 = vld [vmem:[#allocation12 + $0x60] ss:$12 sps:$4 sm:$0xff]   ;;  %v90_v16 = vld [vmem:[%s3273_s2 + $0x10] sm:$0xff] }
  0x2a   :  { %383 = vst.msk [vmem:[#allocation4 + $0x30] sm:$0xff] %vm3282_vm0, %v2505_v0  ;;  %384 = vst.msk [vmem:[#allocation4 + $0x38] sm:$0xff] %vm3282_vm0, %v2505_v0  ;;  %s80_s11 = scalar_lea.vmem %s3276_s5, %s3306_s0  ;;  %2114 = vmatprep.subr.bf16.mxu0 %v2300_v3  ;;  %2273 = vmatprep.subr.bf16.mxu1 %v2300_v3  ;;  %v89_v7 = vld [vmem:[%s3273_s2 + $0x8] sm:$0xff]  ;;  %v96_v8 = vld [vmem:[%s3273_s2 + $0x40] sm:$0xff]  ;;  %p1916_p2 = scmp.le.s32.totalorder %s3272_s1, 0 }
  0x2b   :  { %385 = vst.msk [vmem:[#allocation4 + $0x40] sm:$0xff] %vm3282_vm0, %v2505_v0  ;;  %386 = vst.msk [vmem:[#allocation4 + $0x48] sm:$0xff] %vm3282_vm0, %v2505_v0  ;;  %v104_v9 = vpack.c.bf16 %v89_v7, %v88_v6  ;;  %v97_v10 = vld [vmem:[%s3273_s2 + $0x48] sm:$0xff]  ;;  %v2304_v13 = vld [vmem:[#allocation12 + $0x30] ss:$12 sps:$4 sm:$0xff]  }
  0x2c   :  { %387 = vst.msk [vmem:[#allocation4 + $0x50] sm:$0xff] %vm3282_vm0, %v2505_v0  ;;  %388 = vst.msk [vmem:[#allocation4 + $0x58] sm:$0xff] %vm3282_vm0, %v2505_v0  ;;  %v108_v11 = vpack.c.bf16 %v97_v10, %v96_v8  ;;  %v2303_v12 = vld [vmem:[#allocation12 + $0x48] ss:$12 sps:$4 sm:$0xff]   ;;  %v2305_v14 = vld [vmem:[#allocation12 + $0x18] ss:$12 sps:$4 sm:$0xff]  }
  0x2d   :  { %389 = vst.msk [vmem:[#allocation4 + $0x60] sm:$0xff] %vm3282_vm0, %v2505_v0  ;;  %390 = vst.msk [vmem:[#allocation4 + $0x68] sm:$0xff] %vm3282_vm0, %v2505_v0  ;;  %2115 = vmatpush3.bf16.msra.mxu0 %v2300_v3  ;;  %2281 = vmatpush3.bf16.msra.mxu1 %v2300_v3  ;;  %v2306_v15 = vld [vmem:[#allocation12] ss:$12 sps:$4 sm:$0xff]   ;;  %v91_v17 = vld [vmem:[%s3273_s2 + $0x18] sm:$0xff] }
  0x2e   :  { %391 = vst.msk [vmem:[#allocation4 + $0x70] sm:$0xff] %vm3282_vm0, %v2505_v0  ;;  %392 = vst.msk [vmem:[#allocation4 + $0x78] sm:$0xff] %vm3282_vm0, %v2505_v0  ;;  %2116 = vmatprep.subr.bf16.mxu0 %v2301_v4  ;;  %2274 = vmatprep.subr.bf16.mxu1 %v2301_v4  ;;  %v98_v18 = vld [vmem:[%s3273_s2 + $0x50] sm:$0xff]  ;;  %v99_v19 = vld [vmem:[%s3273_s2 + $0x58] sm:$0xff]  ;;  %v105_v24 = vpack.c.bf16 %v91_v17, %v90_v16 }
  0x2f   :  { %393 = vst.msk [vmem:[#allocation5] sm:$0xff] %vm3282_vm0, %v2506_v1  ;;  %394 = vst.msk [vmem:[#allocation5 + $0x8] sm:$0xff] %vm3282_vm0, %v2506_v1  ;;  %2128 = vmatprep.mubr.bf16.mxu0 %v104_v9  ;;  %2136 = vmatprep.mubr.bf16.mxu1 %v108_v11  ;;  %v92_v20 = vld [vmem:[%s3273_s2 + $0x20] sm:$0xff]  ;;  %v93_v21 = vld [vmem:[%s3273_s2 + $0x28] sm:$0xff]  ;;  %v109_v25 = vpack.c.bf16 %v99_v19, %v98_v18 }
  0x30   :  { %395 = vst.msk [vmem:[#allocation5 + $0x10] sm:$0xff] %vm3282_vm0, %v2506_v1  ;;  %396 = vst.msk [vmem:[#allocation5 + $0x18] sm:$0xff] %vm3282_vm0, %v2506_v1  ;;  %v100_v22 = vld [vmem:[%s3273_s2 + $0x60] sm:$0xff]  ;;  %v101_v23 = vld [vmem:[%s3273_s2 + $0x68] sm:$0xff]  ;;  %v106_v26 = vpack.c.bf16 %v93_v21, %v92_v20 }
  0x31   :  { %397 = vst.msk [vmem:[#allocation5 + $0x20] sm:$0xff] %vm3282_vm0, %v2506_v1  ;;  %398 = vst.msk [vmem:[#allocation5 + $0x28] sm:$0xff] %vm3282_vm0, %v2506_v1  ;;  %2117 = vmatpush3.bf16.msra.mxu0 %v2301_v4  ;;  %2282 = vmatpush3.bf16.msra.mxu1 %v2301_v4  ;;  %v110_v27 = vpack.c.bf16 %v101_v23, %v100_v22  ;;  %v94_v28 = vld [vmem:[%s3273_s2 + $0x30] sm:$0xff]  ;;  %v95_v29 = vld [vmem:[%s3273_s2 + $0x38] sm:$0xff] }
  0x32   :  { %399 = vst.msk [vmem:[#allocation5 + $0x30] sm:$0xff] %vm3282_vm0, %v2506_v1  ;;  %400 = vst.msk [vmem:[#allocation5 + $0x38] sm:$0xff] %vm3282_vm0, %v2506_v1  ;;  %2118 = vmatprep.subr.bf16.mxu0 %v2302_v5  ;;  %2275 = vmatprep.subr.bf16.mxu1 %v2302_v5  ;;  %v102_v30 = vld [vmem:[%s3273_s2 + $0x70] sm:$0xff]  ;;  %v103_v31 = vld [vmem:[%s3273_s2 + $0x78] sm:$0xff]  ;;  %v107_v32 = vpack.c.bf16 %v95_v29, %v94_v28 }
  0x33   :  { %401 = vst.msk [vmem:[#allocation5 + $0x40] sm:$0xff] %vm3282_vm0, %v2506_v1  ;;  %402 = vst.msk [vmem:[#allocation5 + $0x48] sm:$0xff] %vm3282_vm0, %v2506_v1  ;;  %v111_v33 = vpack.c.bf16 %v103_v31, %v102_v30  ;;  %v1890_v34 = vld [vmem:[%s3278_s7] ss:$0 sm:$0xff] }
  0x34   :  { %403 = vst.msk [vmem:[#allocation5 + $0x50] sm:$0xff] %vm3282_vm0, %v2506_v1  ;;  %404 = vst.msk [vmem:[#allocation5 + $0x58] sm:$0xff] %vm3282_vm0, %v2506_v1 }
  0x35   :  { %405 = vst.msk [vmem:[#allocation5 + $0x60] sm:$0xff] %vm3282_vm0, %v2506_v1  ;;  %406 = vst.msk [vmem:[#allocation5 + $0x68] sm:$0xff] %vm3282_vm0, %v2506_v1  ;;  %2119 = vmatpush3.bf16.msra.mxu0 %v2302_v5  ;;  %2283 = vmatpush3.bf16.msra.mxu1 %v2302_v5 }
  0x36   :  { %407 = vst.msk [vmem:[#allocation5 + $0x70] sm:$0xff] %vm3282_vm0, %v2506_v1  ;;  %408 = vst.msk [vmem:[#allocation5 + $0x78] sm:$0xff] %vm3282_vm0, %v2506_v1  ;;  %2120 = vmatprep.subr.bf16.mxu0 %v2303_v12  ;;  %2276 = vmatprep.subr.bf16.mxu1 %v2303_v12 }
  0x37   :  { %409 = vst [vmem:[#allocation3 + $0x30] sm:$0xff] %v2506_v1  ;;  %410 = vst [vmem:[#allocation3] sm:$0xff] %v2506_v1 }
  0x38   :  { %411 = vst [vmem:[#allocation3 + $0x58] sm:$0xff] %v2506_v1  ;;  %412 = vst [vmem:[#allocation3 + $0x18] sm:$0xff] %v2506_v1 }
  0x39   :  { %413 = vst [vmem:[#allocation3 + $0x50] sm:$0xff] %v2506_v1  ;;  %414 = vst [vmem:[#allocation3 + $0x68] sm:$0xff] %v2506_v1  ;;  %2121 = vmatpush3.bf16.msra.mxu0 %v2303_v12  ;;  %2284 = vmatpush3.bf16.msra.mxu1 %v2303_v12 }
  0x3a   :  { %415 = vst [vmem:[#allocation3 + $0x8] sm:$0xff] %v2506_v1  ;;  %416 = vst [vmem:[#allocation3 + $0x48] sm:$0xff] %v2506_v1  ;;  %2122 = vmatprep.subr.bf16.mxu0 %v2304_v13  ;;  %2277 = vmatprep.subr.bf16.mxu1 %v2304_v13 }
  0x3b   :  { %417 = vst [vmem:[#allocation3 + $0x40] sm:$0xff] %v2506_v1  ;;  %418 = vst [vmem:[#allocation3 + $0x20] sm:$0xff] %v2506_v1 }
  0x3c   :  { %419 = vst [vmem:[#allocation3 + $0x10] sm:$0xff] %v2506_v1  ;;  %420 = vst [vmem:[#allocation3 + $0x38] sm:$0xff] %v2506_v1 }
  0x3d   :  { %421 = vst [vmem:[#allocation3 + $0x60] sm:$0xff] %v2506_v1  ;;  %422 = vst [vmem:[#allocation3 + $0x70] sm:$0xff] %v2506_v1  ;;  %2123 = vmatpush3.bf16.msra.mxu0 %v2304_v13  ;;  %2285 = vmatpush3.bf16.msra.mxu1 %v2304_v13 }
  0x3e   :  { %423 = vst [vmem:[#allocation3 + $0x78] sm:$0xff] %v2506_v1  ;;  %424 = vst [vmem:[#allocation3 + $0x28] sm:$0xff] %v2506_v1  ;;  %2124 = vmatprep.subr.bf16.mxu0 %v2305_v14  ;;  %2278 = vmatprep.subr.bf16.mxu1 %v2305_v14 }
  0x41   :  { %2125 = vmatpush3.bf16.msra.mxu0 %v2305_v14  ;;  %2286 = vmatpush3.bf16.msra.mxu1 %v2305_v14 }
  0x42   :  { %2126 = vmatprep.subr.bf16.mxu0 %v2306_v15  ;;  %2279 = vmatprep.subr.bf16.mxu1 %v2306_v15 }
  0x45   :  { %2127 = vmatpush3.bf16.msra.mxu0 %v2306_v15  ;;  %2287 = vmatpush3.bf16.msra.mxu1 %v2306_v15 }
  0x48   :  { %2129 = vmatmul.mubr.bf16.vlgmr.msra.gmra.mxu0 %v105_v24  ;;  %2137 = vmatmul.mubr.bf16.vlgmr.msra.gmra.mxu1 %v109_v25 }
  0x49   :  { %2132 = vmatprep.mubr.bf16.mxu0 %v106_v26  ;;  %2140 = vmatprep.mubr.bf16.mxu1 %v110_v27 }
  0x50   :  { %2133 = vmatmul.mubr.bf16.gmra.mxu0 %v107_v32  ;;  %2141 = vmatmul.mubr.bf16.gmra.mxu1 %v111_v33 }
 0x108   :  { %v2130_v35 = vpop.f32.mrf.mxu0  ;;  %v2138_v36 = vpop.f32.mrf.mxu1 }
 0x109   :  { %v226_v37 = vadd.f32 %v2130_v35, %v1890_v34  ;;  %v258_v38 = vadd.f32 %v2138_v36, %v1890_v34 }
 0x10a   :  { %v217_v39 = vpop.f32.mrf.mxu0  ;;  %v249_v40 = vpop.f32.mrf.mxu1 }
 0x10b   :  { %v218_v41 = vadd.f32 %v1890_v34, %v217_v39  ;;  %v250_v42 = vadd.f32 %v1890_v34, %v249_v40  ;;  %v282_v47 = vmul.f32 0.088388346, %v226_v37  ;;  %v290_v48 = vmul.f32 0.088388346, %v258_v38 }
 0x10c   :  { %v2131_v43 = vpop.f32.mrf.mxu0  ;;  %v2139_v44 = vpop.f32.mrf.mxu1 }
 0x10d   :  { %v229_v45 = vadd.f32 %v2131_v43, %v1890_v34  ;;  %v261_v46 = vadd.f32 %v2139_v44, %v1890_v34  ;;  %v280_v55 = vmul.f32 0.088388346, %v218_v41  ;;  %v288_v56 = vmul.f32 0.088388346, %v250_v42 }
 0x10e   :  { %v220_v49 = vpop.f32.mrf.mxu0  ;;  %v252_v50 = vpop.f32.mrf.mxu1 }
 0x10f   :  { %v283_v51 = vmul.f32 0.088388346, %v229_v45  ;;  %v291_v52 = vmul.f32 0.088388346, %v261_v46  ;;  %v221_v53 = vadd.f32 %v1890_v34, %v220_v49  ;;  %v253_v54 = vadd.f32 %v1890_v34, %v252_v50 }
 0x110   :  { %v2134_v57 = vpop.f32.mrf.mxu0  ;;  %v2142_v58 = vpop.f32.mrf.mxu1 }
 0x111   :  { %v1993_v59 = vpack.c.bf16 %v283_v51, %v282_v47  ;;  %v2013_v60 = vpack.c.bf16 %v291_v52, %v290_v48  ;;  %v281_v61 = vmul.f32 0.088388346, %v221_v53  ;;  %v289_v62 = vmul.f32 0.088388346, %v253_v54 }
 0x112   :  { %v242_v63 = vadd.f32 %v2134_v57, %v1890_v34  ;;  %v274_v0 = vadd.f32 %v2142_v58, %v1890_v34  ;;  %v233_v1 = vpop.f32.mrf.mxu0  ;;  %v265_v2 = vpop.f32.mrf.mxu1 }
 0x113   :  { %2025 = vst [vmem:[#allocation2 + $0x8] sm:$0xff] %v1993_v59   ;;  %2029 = vst [vmem:[#allocation2 + $0x28] sm:$0xff] %v2013_v60   ;;  %v1988_v3 = vpack.c.bf16 %v281_v61, %v280_v55  ;;  %v2008_v4 = vpack.c.bf16 %v289_v62, %v288_v56  ;;  %v234_v5 = vadd.f32 %v1890_v34, %v233_v1 }
 0x114   :  { %v266_v6 = vadd.f32 %v1890_v34, %v265_v2  ;;  %v2135_v7 = vpop.f32.mrf.mxu0  ;;  %v2143_v8 = vpop.f32.mrf.mxu1  ;;  %v286_v11 = vmul.f32 0.088388346, %v242_v63  ;;  %v294_v12 = vmul.f32 0.088388346, %v274_v0 }
 0x115   :  { %1989 = vst [vmem:[#allocation2] sm:$0xff] %v1988_v3   ;;  %2028 = vst [vmem:[#allocation2 + $0x20] sm:$0xff] %v2008_v4   ;;  %v245_v9 = vadd.f32 %v2135_v7, %v1890_v34  ;;  %v277_v10 = vadd.f32 %v2143_v8, %v1890_v34  ;;  %v284_v19 = vmul.f32 0.088388346, %v234_v5 }
 0x116   :  { %v236_v13 = vpop.f32.mrf.mxu0  ;;  %v268_v14 = vpop.f32.mrf.mxu1  ;;  %v292_v20 = vmul.f32 0.088388346, %v266_v6 }
 0x117   :  { %v287_v15 = vmul.f32 0.088388346, %v245_v9  ;;  %v295_v16 = vmul.f32 0.088388346, %v277_v10  ;;  %v237_v17 = vadd.f32 %v1890_v34, %v236_v13  ;;  %v269_v18 = vadd.f32 %v1890_v34, %v268_v14 }
 0x119   :  { %v2003_v21 = vpack.c.bf16 %v287_v15, %v286_v11  ;;  %v2023_v22 = vpack.c.bf16 %v295_v16, %v294_v12  ;;  %v285_v23 = vmul.f32 0.088388346, %v237_v17  ;;  %v293_v24 = vmul.f32 0.088388346, %v269_v18  ;;  %429 = sbr.rel (%p1916_p2) target bundleno = 1322 (0x52a), region = 41 }
 0x11b   :  { %2027 = vst [vmem:[#allocation2 + $0x18] sm:$0xff] %v2003_v21   ;;  %2031 = vst [vmem:[#allocation2 + $0x38] sm:$0xff] %v2023_v22   ;;  %v1998_v25 = vpack.c.bf16 %v285_v23, %v284_v19  ;;  %v2018_v26 = vpack.c.bf16 %v293_v24, %v292_v20 }
 0x11d   :  { %2026 = vst [vmem:[#allocation2 + $0x10] sm:$0xff] %v1998_v25   ;;  %2030 = vst [vmem:[#allocation2 + $0x30] sm:$0xff] %v2018_v26  }
 0x11e   :  { %v2309_v27 = vld [vmem:[#allocation12 + $0xac] ss:$12 sps:$4 sm:$0xff]   ;;  %v2310_v28 = vld [vmem:[#allocation12 + $0x94] ss:$12 sps:$4 sm:$0xff]   ;;  %v2311_v29 = vld [vmem:[#allocation12 + $0x7c] ss:$12 sps:$4 sm:$0xff]  }
 0x11f   :  { %2144 = vmatprep.subr.bf16.mxu0 %v2309_v27  ;;  %v2312_v30 = vld [vmem:[#allocation12 + $0x64] ss:$12 sps:$4 sm:$0xff]   ;;  %v431_v32 = vld [vmem:[#allocation9 + $0x8] sm:$0xff]  ;;  %v2314_v35 = vld [vmem:[#allocation12 + $0x34] ss:$12 sps:$4 sm:$0xff]   ;;  %v2507_v62 = vmov 0  }
 0x120   :  { %2145 = vmatpush3.bf16.msra.mxu0 %v2309_v27  ;;  %v430_v31 = vld [vmem:[#allocation9] sm:$0xff]  ;;  %v2313_v34 = vld [vmem:[#allocation12 + $0x4c] ss:$12 sps:$4 sm:$0xff]   ;;  %v2315_v36 = vld [vmem:[#allocation12 + $0x1c] ss:$12 sps:$4 sm:$0xff]   ;;  %2308 = vset.pattern.permute.xlu1 %v2507_v62 }
 0x121   :  { %2146 = vmatprep.subr.bf16.mxu0 %v2310_v28  ;;  %v446_v33 = vpack.c.bf16 %v431_v32, %v430_v31  ;;  %v2316_v37 = vld [vmem:[#allocation12 + $0x4] ss:$12 sps:$4 sm:$0xff]   ;;  %v433_v39 = vld [vmem:[#allocation9 + $0x18] sm:$0xff]  ;;  %v435_v41 = vld [vmem:[#allocation9 + $0x28] sm:$0xff]  ;;  %2307 = vset.pattern.permute.xlu0 %v2507_v62 }
 0x122   :  { %v432_v38 = vld [vmem:[#allocation9 + $0x10] sm:$0xff]  ;;  %v434_v40 = vld [vmem:[#allocation9 + $0x20] sm:$0xff]  ;;  %v437_v45 = vld [vmem:[#allocation9 + $0x38] sm:$0xff] }
 0x123   :  { %2160 = vmatprep.mubr.bf16.mxu0 %v446_v33  ;;  %2192 = vmatprep.mubr.bf16.mxu1 %v446_v33  ;;  %v2671_v42 = vpack.c.bf16 %v433_v39, %v432_v38  ;;  %v2673_v43 = vpack.c.bf16 %v435_v41, %v434_v40  ;;  %v436_v44 = vld [vmem:[#allocation9 + $0x30] sm:$0xff]  ;;  %v438_v46 = vld [vmem:[#allocation9 + $0x40] sm:$0xff]  ;;  %v439_v47 = vld [vmem:[#allocation9 + $0x48] sm:$0xff] }
 0x124   :  { %2147 = vmatpush3.bf16.msra.mxu0 %v2310_v28  ;;  %v2677_v48 = vpack.c.bf16 %v437_v45, %v436_v44  ;;  %v2679_v49 = vpack.c.bf16 %v439_v47, %v438_v46  ;;  %v440_v50 = vld [vmem:[#allocation9 + $0x50] sm:$0xff]  ;;  %v441_v51 = vld [vmem:[#allocation9 + $0x58] sm:$0xff]  ;;  %v442_v52 = vld [vmem:[#allocation9 + $0x60] sm:$0xff] }
 0x125   :  { %2148 = vmatprep.subr.bf16.mxu0 %v2311_v29  ;;  %v443_v53 = vld [vmem:[#allocation9 + $0x68] sm:$0xff]  ;;  %v2683_v54 = vpack.c.bf16 %v441_v51, %v440_v50  ;;  %v444_v56 = vld [vmem:[#allocation9 + $0x70] sm:$0xff]  ;;  %v445_v57 = vld [vmem:[#allocation9 + $0x78] sm:$0xff] }
 0x126   :  { %v2685_v55 = vpack.c.bf16 %v443_v53, %v442_v52  ;;  %v2689_v58 = vpack.c.bf16 %v445_v57, %v444_v56  ;;  %v2317_v59 = vld [vmem:[#allocation2] sm:$0xff]   ;;  %v969_v60 = vld [vmem:[%s3275_s4 + $0x10] sm:$0xff]  ;;  %v970_v63 = vld [vmem:[%s3275_s4 + $0x18] sm:$0xff] }
 0x127   :  { %v967_v61 = vld [vmem:[%s3275_s4] sm:$0xff]  ;;  %991 = vperm.xlu1 %2308, %v969_v60   ;;  %v968_v0 = vld [vmem:[%s3275_s4 + $0x8] sm:$0xff]  ;;  %v2325_v1 = vld [vmem:[#allocation12 + $0xb0] ss:$12 sps:$4 sm:$0xff]  }
 0x128   :  { %2149 = vmatpush3.bf16.msra.mxu0 %v2311_v29  ;;  %985 = vperm.xlu0 %2307, %v967_v61   ;;  %v2326_v2 = vld [vmem:[#allocation12 + $0x98] ss:$12 sps:$4 sm:$0xff]   ;;  %v972_v4 = vld [vmem:[%s3275_s4 + $0x28] sm:$0xff]  ;;  %v2713_v6 = vld [vmem:[%s3278_s7 + $0x1] ss:$0 sm:$0xff] }
 0x129   :  { %2150 = vmatprep.subr.bf16.mxu0 %v2312_v30  ;;  %v971_v5 = vld [vmem:[%s3275_s4 + $0x20] sm:$0xff]  ;;  %2176 = vmatprep.subr.bf16.mxu1 %v2325_v1  ;;  %v974_v10 = vld [vmem:[%s3275_s4 + $0x38] sm:$0xff]  ;;  %v973_v11 = vld [vmem:[%s3275_s4 + $0x30] sm:$0xff] }
 0x12a   :  { %2177 = vmatpush3.bf16.msra.mxu1 %v2325_v1  ;;  %v2327_v8 = vld [vmem:[#allocation12 + $0x80] ss:$12 sps:$4 sm:$0xff]   ;;  %v2328_v15 = vld [vmem:[#allocation12 + $0x68] ss:$12 sps:$4 sm:$0xff]   ;;  %v2329_v24 = vld [vmem:[#allocation12 + $0x50] ss:$12 sps:$4 sm:$0xff]  }
 0x12b   :  { %994 = vperm.xlu1 %2308, %v970_v63   ;;  %2178 = vmatprep.subr.bf16.mxu1 %v2326_v2  ;;  %v976_v20 = vld [vmem:[%s3275_s4 + $0x48] sm:$0xff]  ;;  %v975_v21 = vld [vmem:[%s3275_s4 + $0x40] sm:$0xff]  ;;  %v978_v26 = vld [vmem:[%s3275_s4 + $0x58] sm:$0xff] }
 0x12c   :  { %2151 = vmatpush3.bf16.msra.mxu0 %v2312_v30  ;;  %988 = vperm.xlu0 %2307, %v968_v0   ;;  %v977_v27 = vld [vmem:[%s3275_s4 + $0x50] sm:$0xff]  ;;  %v2330_v29 = vld [vmem:[#allocation12 + $0x38] ss:$12 sps:$4 sm:$0xff]   ;;  %v980_v31 = vld [vmem:[%s3275_s4 + $0x68] sm:$0xff] }
 0x12d   :  { %2152 = vmatprep.subr.bf16.mxu0 %v2313_v34  ;;  %v979_v32 = vld [vmem:[%s3275_s4 + $0x60] sm:$0xff]  ;;  %v2332_v39 = vld [vmem:[#allocation12 + $0x8] ss:$12 sps:$4 sm:$0xff]   ;;  %v2320_v0 = vld [vmem:[#allocation2 + $0x18] sm:$0xff]  }
 0x12e   :  { %2179 = vmatpush3.bf16.msra.mxu1 %v2326_v2  ;;  %v2321_v1 = vld [vmem:[#allocation2 + $0x20] sm:$0xff]   ;;  %v2322_v2 = vld [vmem:[#allocation2 + $0x28] sm:$0xff]  }
 0x12f   :  { %1000 = vperm.xlu1 %2308, %v972_v4   ;;  %2180 = vmatprep.subr.bf16.mxu1 %v2327_v8  ;;  %v2324_v4 = vld [vmem:[#allocation2 + $0x38] sm:$0xff]  }
 0x130   :  { %2153 = vmatpush3.bf16.msra.mxu0 %v2313_v34  ;;  %997 = vperm.xlu0 %2307, %v971_v5   ;;  %v2331_v34 = vld [vmem:[#allocation12 + $0x20] ss:$12 sps:$4 sm:$0xff]  }
 0x131   :  { %2154 = vmatprep.subr.bf16.mxu0 %v2314_v35 }
 0x132   :  { %2181 = vmatpush3.bf16.msra.mxu1 %v2327_v8 }
 0x133   :  { %1006 = vperm.xlu1 %2308, %v974_v10   ;;  %2182 = vmatprep.subr.bf16.mxu1 %v2328_v15  ;;  %v2797_v10 = vld [vmem:[%s80_s11] ss:$0 sm:$0xff] }
 0x134   :  { %2155 = vmatpush3.bf16.msra.mxu0 %v2314_v35  ;;  %1003 = vperm.xlu0 %2307, %v973_v11  }
 0x135   :  { %2156 = vmatprep.subr.bf16.mxu0 %v2315_v36 }
 0x136   :  { %2183 = vmatpush3.bf16.msra.mxu1 %v2328_v15 }
 0x137   :  { %1012 = vperm.xlu1 %2308, %v976_v20   ;;  %2184 = vmatprep.subr.bf16.mxu1 %v2329_v24 }
 0x138   :  { %2157 = vmatpush3.bf16.msra.mxu0 %v2315_v36  ;;  %1009 = vperm.xlu0 %2307, %v975_v21   ;;  %v982_v36 = vld [vmem:[%s3275_s4 + $0x78] sm:$0xff] }
 0x139   :  { %2158 = vmatprep.subr.bf16.mxu0 %v2316_v37 }
 0x13a   :  { %2185 = vmatpush3.bf16.msra.mxu1 %v2329_v24 }
 0x13b   :  { %1018 = vperm.xlu1 %2308, %v978_v26   ;;  %2186 = vmatprep.subr.bf16.mxu1 %v2330_v29 }
 0x13c   :  { %2159 = vmatpush3.bf16.msra.mxu0 %v2316_v37  ;;  %1015 = vperm.xlu0 %2307, %v977_v27   ;;  %v981_v37 = vld [vmem:[%s3275_s4 + $0x70] sm:$0xff] }
 0x13e   :  { %2187 = vmatpush3.bf16.msra.mxu1 %v2330_v29 }
 0x13f   :  { %2161 = vmatmul.mubr.bf16.vlgmr.msra.gmra.mxu0 %v2671_v42  ;;  %1024 = vperm.xlu1 %2308, %v980_v31  }
 0x140   :  { %2164 = vmatprep.mubr.bf16.mxu0 %v2673_v43  ;;  %1021 = vperm.xlu0 %2307, %v979_v32  }
 0x141   :  { %2188 = vmatprep.subr.bf16.mxu1 %v2331_v34 }
 0x142   :  { %2189 = vmatpush3.bf16.msra.mxu1 %v2331_v34 }
 0x143   :  { %1030 = vperm.xlu1 %2308, %v982_v36   ;;  %2190 = vmatprep.subr.bf16.mxu1 %v2332_v39 }
 0x144   :  { %1027 = vperm.xlu0 %2307, %v981_v37  }
 0x146   :  { %2191 = vmatpush3.bf16.msra.mxu1 %v2332_v39 }
 0x147   :  { %2165 = vmatmul.mubr.bf16.gmra.mxu0 %v2677_v48 }
 0x148   :  { %2168 = vmatprep.mubr.bf16.mxu0 %v2679_v49 }
 0x149   :  { %2193 = vmatmul.mubr.bf16.vlgmr.msra.gmra.mxu1 %v2671_v42 }
 0x14a   :  { %2196 = vmatprep.mubr.bf16.mxu1 %v2673_v43 }
 0x14f   :  { %2169 = vmatmul.mubr.bf16.gmra.mxu0 %v2683_v54 }
 0x150   :  { %2172 = vmatprep.mubr.bf16.mxu0 %v2685_v55 }
 0x151   :  { %2197 = vmatmul.mubr.bf16.gmra.mxu1 %v2677_v48 }
 0x152   :  { %2200 = vmatprep.mubr.bf16.mxu1 %v2679_v49 }
 0x157   :  { %2173 = vmatmul.mubr.bf16.gmra.mxu0 %v2689_v58 }
 0x158   :  { %2224 = vmatprep.mubr.bf16.mxu0 %v2317_v59 }
 0x159   :  { %2201 = vmatmul.mubr.bf16.gmra.mxu1 %v2683_v54 }
 0x15a   :  { %2204 = vmatprep.mubr.bf16.mxu1 %v2685_v55  ;;  %v2318_v55 = vld [vmem:[#allocation2 + $0x8] sm:$0xff]  }
 0x161   :  { %2205 = vmatmul.mubr.bf16.gmra.mxu1 %v2689_v58  ;;  %v2319_v58 = vld [vmem:[#allocation2 + $0x10] sm:$0xff]  }
 0x1a3   :  { %v2782_v5 = vpop.permute.xlu0 %985 }
 0x1a4   :  { %vm1036_vm1 = vcmp.eq.s32.totalorder %v2782_v5, %v2797_v10 }
 0x1ff   :  { %v2162_v3 = vpop.f32.mrf.mxu0 }
 0x200   :  { %v568_v12 = vadd.f32 %v2162_v3, %v2713_v6  ;;  %v2323_v3 = vld [vmem:[#allocation2 + $0x30] sm:$0xff]  }
 0x201   :  { %v559_v7 = vpop.f32.mrf.mxu0 }
 0x202   :  { %v560_v16 = vadd.f32 %v2713_v6, %v559_v7  ;;  %v2786_v7 = vpop.permute.xlu0 %988 }
 0x203   :  { %v2163_v9 = vpop.f32.mrf.mxu0  ;;  %vm1037_vm3 = vcmp.eq.s32.totalorder %v2786_v7, %v2797_v10 }
 0x204   :  { %v571_v13 = vadd.f32 %v2163_v9, %v2713_v6 }
 0x205   :  { %v562_v14 = vpop.f32.mrf.mxu0 }
 0x206   :  { %v2724_v17 = vpack.c.bf16 %v571_v13, %v568_v12  ;;  %v563_v18 = vadd.f32 %v2713_v6, %v562_v14  ;;  %v2790_v9 = vpop.permute.xlu0 %997 }
 0x207   :  { %v2727_v19 = vpop.f32.mrf.mxu0  ;;  %vm1040_vm5 = vcmp.eq.s32.totalorder %v2790_v9, %v2797_v10 }
 0x208   :  { %v2735_v22 = vpack.c.bf16 %v563_v18, %v560_v16  ;;  %v584_v48 = vadd.f32 %v2727_v19, %v2713_v6 }
 0x209   :  { %v2737_v23 = vpop.f32.mrf.mxu0 }
 0x20a   :  { %v576_v54 = vadd.f32 %v2713_v6, %v2737_v23  ;;  %v2803_v14 = vpop.permute.xlu0 %1003 }
 0x20b   :  { %v2167_v25 = vpop.f32.mrf.mxu0  ;;  %vm1042_vm7 = vcmp.eq.s32.totalorder %v2803_v14, %v2797_v10 }
 0x20c   :  { %v587_v61 = vadd.f32 %v2167_v25, %v2713_v6 }
 0x20d   :  { %v578_v28 = vpop.f32.mrf.mxu0 }
 0x20e   :  { %v625_v49 = vpack.c.bf16 %v587_v61, %v584_v48  ;;  %v579_v62 = vadd.f32 %v2713_v6, %v578_v28 }
 0x20f   :  { %v2170_v30 = vpop.f32.mrf.mxu0 }
 0x210   :  { %v600_v57 = vadd.f32 %v2170_v30, %v2713_v6  ;;  %v624_v63 = vpack.c.bf16 %v579_v62, %v576_v54 }
 0x211   :  { %v591_v33 = vpop.f32.mrf.mxu0 }
 0x212   :  { %v592_v42 = vadd.f32 %v2713_v6, %v591_v33 }
 0x213   :  { %v2171_v35 = vpop.f32.mrf.mxu0 }
 0x214   :  { %v603_v56 = vadd.f32 %v2171_v35, %v2713_v6 }
 0x215   :  { %v594_v38 = vpop.f32.mrf.mxu0 }
 0x216   :  { %v627_v59 = vpack.c.bf16 %v603_v56, %v600_v57  ;;  %v595_v60 = vadd.f32 %v2713_v6, %v594_v38 }
 0x217   :  { %v2174_v40 = vpop.f32.mrf.mxu0 }
 0x218   :  { %v616_v45 = vadd.f32 %v2174_v40, %v2713_v6  ;;  %v626_v43 = vpack.c.bf16 %v595_v60, %v592_v42  ;;  %v2194_v42 = vpop.f32.mrf.mxu1 }
 0x219   :  { %v607_v41 = vpop.f32.mrf.mxu0 }
 0x21a   :  { %v608_v50 = vadd.f32 %v2713_v6, %v607_v41 }
 0x21b   :  { %v2175_v44 = vpop.f32.mrf.mxu0 }
 0x21c   :  { %v619_v46 = vadd.f32 %v2175_v44, %v2713_v6 }
 0x21d   :  { %v610_v47 = vpop.f32.mrf.mxu0 }
 0x21e   :  { %v629_v51 = vpack.c.bf16 %v619_v46, %v616_v45  ;;  %v611_v52 = vadd.f32 %v2713_v6, %v610_v47  ;;  %v2784_v6 = vpop.permute.xlu1 %991 }
 0x21f   :  { %vm1038_vm2 = vcmp.eq.s32.totalorder %v2784_v6, %v2797_v10 }
 0x220   :  { %v628_v53 = vpack.c.bf16 %v611_v52, %v608_v50  ;;  %2208 = vmatprep.subr.bf16.mxu0 %v629_v51 }
 0x221   :  { %2209 = vmatpush3.bf16.xpose.msra.mxu0 %v629_v51 }
 0x222   :  { %2210 = vmatprep.subr.bf16.mxu0 %v628_v53  ;;  %v2788_v8 = vpop.permute.xlu1 %994 }
 0x223   :  { %vm1039_vm4 = vcmp.eq.s32.totalorder %v2788_v8, %v2797_v10 }
 0x226   :  { %v2801_v12 = vpop.permute.xlu1 %1000 }
 0x227   :  { %vm1041_vm6 = vcmp.eq.s32.totalorder %v2801_v12, %v2797_v10 }
 0x229   :  { %2211 = vmatpush3.bf16.xpose.msra.mxu0 %v628_v53 }
 0x22a   :  { %2212 = vmatprep.subr.bf16.mxu0 %v627_v59  ;;  %v2815_v18 = vpop.permute.xlu1 %1006 }
 0x22b   :  { %vm1043_vm8 = vcmp.eq.s32.totalorder %v2815_v18, %v2797_v10 }
 0x22e   :  { %v2847_v27 = vpop.permute.xlu1 %1012 }
 0x22f   :  { %vm1045_vm10 = vcmp.eq.s32.totalorder %v2847_v27, %v2797_v10 }
 0x231   :  { %2213 = vmatpush3.bf16.xpose.msra.mxu0 %v627_v59 }
 0x232   :  { %2214 = vmatprep.subr.bf16.mxu0 %v626_v43  ;;  %v2871_v34 = vpop.permute.xlu1 %1018 }
 0x233   :  { %vm1047_vm12 = vcmp.eq.s32.totalorder %v2871_v34, %v2797_v10 }
 0x236   :  { %v2903_v45 = vpop.permute.xlu1 %1024 }
 0x237   :  { %vm1049_vm14 = vcmp.eq.s32.totalorder %v2903_v45, %v2797_v10 }
 0x239   :  { %2215 = vmatpush3.bf16.xpose.msra.mxu0 %v626_v43  ;;  %v735_v43 = vpop.f32.mrf.mxu1 }
 0x23a   :  { %2216 = vmatprep.subr.bf16.mxu0 %v625_v49  ;;  %v2927_v56 = vpop.permute.xlu1 %1030 }
 0x23b   :  { %v2195_v61 = vpop.f32.mrf.mxu1 }
 0x23d   :  { %v738_v48 = vpop.f32.mrf.mxu1 }
 0x241   :  { %2217 = vmatpush3.bf16.xpose.msra.mxu0 %v625_v49  ;;  %v2198_v49 = vpop.f32.mrf.mxu1 }
 0x242   :  { %2218 = vmatprep.subr.bf16.mxu0 %v624_v63 }
 0x243   :  { %v751_v62 = vpop.f32.mrf.mxu1 }
 0x245   :  { %v2199_v54 = vpop.f32.mrf.mxu1 }
 0x249   :  { %2219 = vmatpush3.bf16.xpose.msra.mxu0 %v624_v63  ;;  %v754_v63 = vpop.f32.mrf.mxu1 }
 0x24a   :  { %2220 = vmatprep.subr.bf16.mxu0 %v2724_v17 }
 0x251   :  { %2221 = vmatpush3.bf16.xpose.msra.mxu0 %v2724_v17 }
 0x252   :  { %2222 = vmatprep.subr.bf16.mxu0 %v2735_v22 }
 0x259   :  { %2223 = vmatpush3.bf16.xpose.msra.mxu0 %v2735_v22  ;;  %v2831_v22 = vpop.permute.xlu0 %1009 }
 0x25a   :  { %vm1044_vm9 = vcmp.eq.s32.totalorder %v2831_v22, %v2797_v10 }
 0x25d   :  { %v2853_v29 = vpop.permute.xlu0 %1015 }
 0x25e   :  { %vm1046_vm11 = vcmp.eq.s32.totalorder %v2853_v29, %v2797_v10 }
 0x260   :  { %2225 = vmatmul.mubr.bf16.vlgmr.msra.gmra.mxu0 %v2318_v55  ;;  %v2202_v55 = vpop.f32.mrf.mxu1 }
 0x261   :  { %2228 = vmatprep.mubr.bf16.mxu0 %v2319_v58  ;;  %v2885_v38 = vpop.permute.xlu0 %1021 }
 0x262   :  { %vm3280_vm13 = vcmp.eq.s32.totalorder %v2885_v38, %v2797_v10  ;;  %v767_v58 = vpop.f32.mrf.mxu1 }
 0x265   :  { %v2909_v47 = vpop.permute.xlu0 %1027 }
 0x266   :  { %vm1050_vm15 = vcmp.eq.s32.totalorder %v2909_v47, %v2797_v10 }
 0x268   :  { %2229 = vmatmul.mubr.bf16.gmra.mxu0 %v2320_v0  ;;  %v2203_v0 = vpop.f32.mrf.mxu1 }
 0x269   :  { %2232 = vmatprep.mubr.bf16.mxu0 %v2321_v1 }
 0x26a   :  { %v770_v1 = vpop.f32.mrf.mxu1 }
 0x270   :  { %2233 = vmatmul.mubr.bf16.gmra.mxu0 %v2322_v2  ;;  %v1926_v2 = vld [vmem:[%s3278_s7 + $0x2] ss:$0 sm:$0xff] }
 0x271   :  { %2236 = vmatprep.mubr.bf16.mxu0 %v2323_v3  ;;  %v2206_v3 = vpop.f32.mrf.mxu1 }
 0x278   :  { %2237 = vmatmul.mubr.bf16.gmra.mxu0 %v2324_v4  ;;  %v783_v4 = vpop.f32.mrf.mxu1 }
 0x320   :  { %v2226_v11 = vpop.f32.mrf.mxu0 }
 0x321   :  { %v2820_v19 = vsel %vm1038_vm2, %v2226_v11, -1e+30  ;;  %v792_v11 = vadd.f32 %v2206_v3, %v1926_v2  ;;  %v752_v3 = vadd.f32 %v1926_v2, %v751_v62  ;;  %v1068_v62 = vld [vmem:[#allocation4] sm:$0xff] }
 0x322   :  { %v904_v13 = vpop.f32.mrf.mxu0 }
 0x323   :  { %v2808_v15 = vsel %vm1036_vm1, %v904_v13, -1e+30  ;;  %v2207_v13 = vpop.f32.mrf.mxu1 }
 0x324   :  { %1084 = vmax.xlane.f32.xlu0 %v2808_v15  ;;  %v2227_v16 = vpop.f32.mrf.mxu0 }
 0x325   :  { %v2838_v24 = vsel %vm1039_vm4, %v2227_v16, -1e+30  ;;  %v784_v16 = vadd.f32 %v1926_v2, %v783_v4 }
 0x326   :  { %v907_v17 = vpop.f32.mrf.mxu0 }
 0x327   :  { %v2825_v20 = vsel %vm1037_vm3, %v907_v17, -1e+30  ;;  %v795_v17 = vadd.f32 %v2207_v13, %v1926_v2  ;;  %v755_v13 = vadd.f32 %v1926_v2, %v754_v63 }
 0x328   :  { %1088 = vmax.xlane.f32.xlu0 %v2820_v19  ;;  %1086 = vmax.xlane.f32.xlu1 %v2825_v20  ;;  %v2230_v21 = vpop.f32.mrf.mxu0 }
 0x329   :  { %v2858_v30 = vsel %vm1042_vm7, %v2230_v21, -1e+30  ;;  %v786_v21 = vpop.f32.mrf.mxu1 }
 0x32a   :  { %v920_v23 = vpop.f32.mrf.mxu0 }
 0x32b   :  { %v2843_v25 = vsel %vm1040_vm5, %v920_v23, -1e+30  ;;  %v776_v23 = vadd.f32 %v2202_v55, %v1926_v2  ;;  %v744_v55 = vadd.f32 %v2194_v42, %v1926_v2 }
 0x32c   :  { %1090 = vmax.xlane.f32.xlu0 %v2838_v24  ;;  %1092 = vmax.xlane.f32.xlu1 %v2843_v25  ;;  %v2231_v26 = vpop.f32.mrf.mxu0 }
 0x32d   :  { %v2876_v35 = vsel %vm1043_vm8, %v2231_v26, -1e+30  ;;  %v779_v26 = vadd.f32 %v2203_v0, %v1926_v2  ;;  %v747_v0 = vadd.f32 %v2195_v61, %v1926_v2 }
 0x32e   :  { %v923_v28 = vpop.f32.mrf.mxu0 }
 0x32f   :  { %v2863_v31 = vsel %vm1041_vm6, %v923_v28, -1e+30  ;;  %v805_v28 = vpack.c.bf16 %v795_v17, %v792_v11  ;;  %v800_v11 = vpack.c.bf16 %v755_v13, %v752_v3  ;;  %v1070_v17 = vld [vmem:[#allocation4 + $0x10] sm:$0xff]  ;;  %v2971_v13 = vld [vmem:[#allocation4 + $0x40] sm:$0xff] }
 0x330   :  { %1096 = vmax.xlane.f32.xlu1 %v2858_v30  ;;  %1094 = vmax.xlane.f32.xlu0 %v2863_v31  ;;  %v2234_v32 = vpop.f32.mrf.mxu0 }
 0x331   :  { %v2894_v40 = vsel %vm1046_vm11, %v2234_v32, -1e+30  ;;  %v787_v32 = vadd.f32 %v1926_v2, %v786_v21  ;;  %2240 = vmatprep.subr.bf16.mxu1 %v805_v28  ;;  %v1069_v21 = vld [vmem:[#allocation4 + $0x8] sm:$0xff] }
 0x332   :  { %v936_v33 = vpop.f32.mrf.mxu0  ;;  %2241 = vmatpush3.bf16.msra.mxu1 %v805_v28 }
 0x333   :  { %v2881_v36 = vsel %vm1044_vm9, %v936_v33, -1e+30  ;;  %v804_v33 = vpack.c.bf16 %v787_v32, %v784_v16  ;;  %v799_v16 = vpack.c.bf16 %v747_v0, %v744_v55 }
 0x334   :  { %1098 = vmax.xlane.f32.xlu0 %v2876_v35  ;;  %1100 = vmax.xlane.f32.xlu1 %v2881_v36  ;;  %v2235_v37 = vpop.f32.mrf.mxu0 }
 0x335   :  { %v2914_v50 = vsel %vm1047_vm12, %v2235_v37, -1e+30  ;;  %v768_v37 = vadd.f32 %v1926_v2, %v767_v58  ;;  %2242 = vmatprep.subr.bf16.mxu1 %v804_v33  ;;  %v736_v58 = vadd.f32 %v1926_v2, %v735_v43 }
 0x336   :  { %v939_v39 = vpop.f32.mrf.mxu0  ;;  %2243 = vmatpush3.bf16.msra.mxu1 %v804_v33 }
 0x337   :  { %v2899_v41 = vsel %vm1045_vm10, %v939_v39, -1e+30  ;;  %v803_v39 = vpack.c.bf16 %v779_v26, %v776_v23 }
 0x338   :  { %1104 = vmax.xlane.f32.xlu1 %v2894_v40  ;;  %1102 = vmax.xlane.f32.xlu0 %v2899_v41  ;;  %v2238_v44 = vpop.f32.mrf.mxu0 }
 0x339   :  { %v2932_v57 = vsel %vm1050_vm15, %v2238_v44, -1e+30  ;;  %v771_v44 = vadd.f32 %v1926_v2, %v770_v1  ;;  %2244 = vmatprep.subr.bf16.mxu1 %v803_v39  ;;  %v739_v1 = vadd.f32 %v1926_v2, %v738_v48  ;;  %v2953_v48 = vld [vmem:[#allocation4 + $0x18] sm:$0xff] }
 0x33a   :  { %v952_v46 = vpop.f32.mrf.mxu0  ;;  %2245 = vmatpush3.bf16.msra.mxu1 %v803_v39  ;;  %v2960_v39 = vld [vmem:[#allocation4 + $0x28] sm:$0xff] }
 0x33b   :  { %v2919_v51 = vsel %vm3280_vm13, %v952_v46, -1e+30  ;;  %vm1051_vm13 = vcmp.eq.s32.totalorder %v2927_v56, %v2797_v10  ;;  %v760_v46 = vadd.f32 %v2198_v49, %v1926_v2  ;;  %v798_v49 = vpack.c.bf16 %v739_v1, %v736_v58 }
 0x33c   :  { %1106 = vmax.xlane.f32.xlu0 %v2914_v50  ;;  %1108 = vmax.xlane.f32.xlu1 %v2919_v51  ;;  %v2239_v52 = vpop.f32.mrf.mxu0 }
 0x33d   :  { %v2946_v60 = vsel %vm1051_vm13, %v2239_v52, -1e+30  ;;  %v763_v52 = vadd.f32 %v2199_v54, %v1926_v2  ;;  %v1072_v2 = vld [vmem:[#allocation4 + $0x20] sm:$0xff] }
 0x33e   :  { %v955_v53 = vpop.f32.mrf.mxu0 }
 0x33f   :  { %v2937_v59 = vsel %vm1049_vm14, %v955_v53, -1e+30  ;;  %v802_v53 = vpack.c.bf16 %v771_v44, %v768_v37  ;;  %v801_v4 = vpack.c.bf16 %v763_v52, %v760_v46  ;;  %v1074_v37 = vld [vmem:[#allocation4 + $0x30] sm:$0xff] }
 0x340   :  { %1112 = vmax.xlane.f32.xlu1 %v2932_v57  ;;  %1110 = vmax.xlane.f32.xlu0 %v2937_v59 }
 0x341   :  { %2246 = vmatprep.subr.bf16.mxu1 %v802_v53 }
 0x342   :  { %2247 = vmatpush3.bf16.msra.mxu1 %v802_v53 }
 0x343   :  { %2248 = vmatprep.subr.bf16.mxu1 %v801_v4 }
 0x344   :  { %1114 = vmax.xlane.f32.xlu0 %v2946_v60 }
 0x346   :  { %2249 = vmatpush3.bf16.msra.mxu1 %v801_v4  ;;  %v2969_v4 = vld [vmem:[#allocation4 + $0x38] sm:$0xff] }
 0x347   :  { %2250 = vmatprep.subr.bf16.mxu1 %v800_v11 }
 0x34a   :  { %2251 = vmatpush3.bf16.msra.mxu1 %v800_v11 }
 0x34b   :  { %2252 = vmatprep.subr.bf16.mxu1 %v799_v16 }
 0x34e   :  { %2253 = vmatpush3.bf16.msra.mxu1 %v799_v16 }
 0x34f   :  { %2254 = vmatprep.subr.bf16.mxu1 %v798_v49 }
 0x352   :  { %2255 = vmatpush3.bf16.msra.mxu1 %v798_v49 }
 0x3ad   :  { %v1085_v54 = vpop.xlane.xlu0 %1084 }
 0x3ae   :  { %v1116_v63 = vmax.f32 %v1068_v62, %v1085_v54  ;;  %v1078_v54 = vld [vmem:[#allocation4 + $0x50] sm:$0xff] }
 0x3b0   :  { %1670 = vst.msk [vmem:[#allocation4] sm:$0xff] %vm3282_vm0, %v1116_v63  ;;  %1134 = vperm.xlu1 %2308, %v1116_v63   ;;  %v1276_v55 = vsub.f32 %v1068_v62, %v1116_v63 }
 0x3b1   :  { %v1089_v42 = vpop.xlane.xlu0 %1088  ;;  %v1087_v61 = vpop.xlane.xlu1 %1086 }
 0x3b2   :  { %v1118_v43 = vmax.f32 %v1070_v17, %v1089_v42  ;;  %v1117_v23 = vmax.f32 %v1069_v21, %v1087_v61  ;;  %v1292_v61 = vmul.f32 1.442695, %v1276_v55 }
 0x3b4   :  { %1672 = vst.msk [vmem:[#allocation4 + $0x10] sm:$0xff] %vm3282_vm0, %v1118_v43  ;;  %1671 = vst.msk [vmem:[#allocation4 + $0x8] sm:$0xff] %vm3282_vm0, %v1117_v23  ;;  %1144 = vperm.xlu1 %2308, %v1118_v43   ;;  %1139 = vperm.xlu0 %2307, %v1117_v23   ;;  %v1277_v52 = vsub.f32 %v1069_v21, %v1117_v23  ;;  %v2979_v21 = vld [vmem:[#allocation4 + $0x48] sm:$0xff]  ;;  %v1278_v42 = vsub.f32 %v1070_v17, %v1118_v43 }
 0x3b5   :  { %v1091_v26 = vpop.xlane.xlu0 %1090  ;;  %v1093_v28 = vpop.xlane.xlu1 %1092 }
 0x3b6   :  { %v2958_v32 = vmax.f32 %v2953_v48, %v1091_v26  ;;  %v1120_v33 = vmax.f32 %v1072_v2, %v1093_v28  ;;  %v1294_v58 = vmul.f32 1.442695, %v1277_v52  ;;  %v1296_v17 = vmul.f32 1.442695, %v1278_v42 }
 0x3b8   :  { %1673 = vst.msk [vmem:[#allocation4 + $0x18] sm:$0xff] %vm3282_vm0, %v2958_v32  ;;  %1674 = vst.msk [vmem:[#allocation4 + $0x20] sm:$0xff] %vm3282_vm0, %v1120_v33  ;;  %1149 = vperm.xlu1 %2308, %v2958_v32   ;;  %1154 = vperm.xlu0 %2307, %v1120_v33   ;;  %v1280_v16 = vsub.f32 %v1072_v2, %v1120_v33  ;;  %2333 = vpow2.f32 %v1294_v58  ;;  %v2986_v33 = vld [vmem:[#allocation4 + $0x58] sm:$0xff]  ;;  %v1279_v43 = vsub.f32 %v2953_v48, %v2958_v32  ;;  %v1081_v58 = vld [vmem:[#allocation4 + $0x68] sm:$0xff] }
 0x3b9   :  { %v1097_v44 = vpop.xlane.xlu1 %1096  ;;  %v1095_v46 = vpop.xlane.xlu0 %1094  ;;  %2335 = vpow2.f32 %v1292_v61 }
 0x3ba   :  { %v1122_v53 = vmax.f32 %v1074_v37, %v1097_v44  ;;  %v2967_v3 = vmax.f32 %v2960_v39, %v1095_v46  ;;  %v1300_v2 = vmul.f32 1.442695, %v1280_v16  ;;  %v1080_v44 = vld [vmem:[#allocation4 + $0x60] sm:$0xff]  ;;  %v1298_v16 = vmul.f32 1.442695, %v1279_v43 }
 0x3bc   :  { %1676 = vst.msk [vmem:[#allocation4 + $0x30] sm:$0xff] %vm3282_vm0, %v1122_v53  ;;  %1675 = vst.msk [vmem:[#allocation4 + $0x28] sm:$0xff] %vm3282_vm0, %v2967_v3  ;;  %1159 = vperm.xlu1 %2308, %v2967_v3   ;;  %1164 = vperm.xlu0 %2307, %v1122_v53   ;;  %v1282_v62 = vsub.f32 %v1074_v37, %v1122_v53  ;;  %2337 = vpow2.f32 %v1300_v2 }
 0x3bd   :  { %v1099_v0 = vpop.xlane.xlu0 %1098  ;;  %v1101_v11 = vpop.xlane.xlu1 %1100  ;;  %2339 = vpow2.f32 %v1296_v17 }
 0x3be   :  { %v1123_v1 = vmax.f32 %v2969_v4, %v1099_v0  ;;  %v1124_v49 = vmax.f32 %v2971_v13, %v1101_v11  ;;  %v1304_v37 = vmul.f32 1.442695, %v1282_v62  ;;  %v2995_v11 = vld [vmem:[#allocation4 + $0x70] sm:$0xff] }
 0x3c0   :  { %1677 = vst.msk [vmem:[#allocation4 + $0x38] sm:$0xff] %vm3282_vm0, %v1123_v1  ;;  %1678 = vst.msk [vmem:[#allocation4 + $0x40] sm:$0xff] %vm3282_vm0, %v1124_v49  ;;  %1169 = vperm.xlu1 %2308, %v1123_v1   ;;  %1174 = vperm.xlu0 %2307, %v1124_v49   ;;  %2341 = vpow2.f32 %v1304_v37  ;;  %v1283_v48 = vsub.f32 %v2969_v4, %v1123_v1  ;;  %v1281_v4 = vsub.f32 %v2960_v39, %v2967_v3 }
 0x3c1   :  { %v1105_v63 = vpop.xlane.xlu1 %1104  ;;  %v1103_v23 = vpop.xlane.xlu0 %1102  ;;  %2343 = vpow2.f32 %v1298_v16 }
 0x3c2   :  { %v1126_v26 = vmax.f32 %v1078_v54, %v1105_v63  ;;  %v2984_v28 = vmax.f32 %v2979_v21, %v1103_v23  ;;  %v3004_v23 = vld [vmem:[#allocation4 + $0x78] sm:$0xff]  ;;  %v1302_v39 = vmul.f32 1.442695, %v1281_v4 }
 0x3c4   :  { %1680 = vst.msk [vmem:[#allocation4 + $0x50] sm:$0xff] %vm3282_vm0, %v1126_v26  ;;  %1679 = vst.msk [vmem:[#allocation4 + $0x48] sm:$0xff] %vm3282_vm0, %v2984_v28  ;;  %1179 = vperm.xlu1 %2308, %v2984_v28   ;;  %1184 = vperm.xlu0 %2307, %v1126_v26   ;;  %v1286_v53 = vsub.f32 %v1078_v54, %v1126_v26  ;;  %v1284_v54 = vsub.f32 %v2971_v13, %v1124_v49  ;;  %v1306_v13 = vmul.f32 1.442695, %v1283_v48 }
 0x3c5   :  { %v1107_v46 = vpop.xlane.xlu0 %1106  ;;  %v1109_v52 = vpop.xlane.xlu1 %1108  ;;  %v1285_v16 = vsub.f32 %v2979_v21, %v2984_v28 }
 0x3c6   :  { %v1127_v55 = vmax.f32 %v2986_v33, %v1107_v46  ;;  %v1128_v0 = vmax.f32 %v1080_v44, %v1109_v52  ;;  %v1312_v61 = vmul.f32 1.442695, %v1286_v53  ;;  %v1308_v49 = vmul.f32 1.442695, %v1284_v54  ;;  %v3017_v43 = vpop.eup %2333 }
 0x3c7   :  { %v3025_v3 = vpop.eup %2335 }
 0x3c8   :  { %1681 = vst.msk [vmem:[#allocation4 + $0x58] sm:$0xff] %vm3282_vm0, %v1127_v55  ;;  %1682 = vst.msk [vmem:[#allocation4 + $0x60] sm:$0xff] %vm3282_vm0, %v1128_v0  ;;  %1189 = vperm.xlu1 %2308, %v1127_v55   ;;  %1194 = vperm.xlu0 %2307, %v1128_v0   ;;  %2345 = vpow2.f32 %v1312_v61  ;;  %v1288_v26 = vsub.f32 %v1080_v44, %v1128_v0  ;;  %v1287_v44 = vsub.f32 %v2986_v33, %v1127_v55 }
 0x3c9   :  { %v1113_v32 = vpop.xlane.xlu1 %1112  ;;  %v1111_v42 = vpop.xlane.xlu0 %1110  ;;  %2347 = vpow2.f32 %v1306_v13  ;;  %v1310_v55 = vmul.f32 1.442695, %v1285_v16 }
 0x3ca   :  { %v3002_v62 = vmax.f32 %v2995_v11, %v1113_v32  ;;  %v1129_v63 = vmax.f32 %v1081_v58, %v1111_v42  ;;  %2349 = vpow2.f32 %v1308_v49  ;;  %v1316_v46 = vmul.f32 1.442695, %v1288_v26  ;;  %v3028_v52 = vpop.eup %2337 }
 0x3cb   :  { %v3032_v53 = vpop.eup %2339  ;;  %2351 = vpow2.f32 %v1302_v39  ;;  %v1314_v48 = vmul.f32 1.442695, %v1287_v44 }
 0x3cc   :  { %1684 = vst.msk [vmem:[#allocation4 + $0x70] sm:$0xff] %vm3282_vm0, %v3002_v62  ;;  %1683 = vst.msk [vmem:[#allocation4 + $0x68] sm:$0xff] %vm3282_vm0, %v1129_v63  ;;  %1204 = vperm.xlu0 %2307, %v3002_v62   ;;  %1199 = vperm.xlu1 %2308, %v1129_v63   ;;  %2353 = vpow2.f32 %v1316_v46  ;;  %v1289_v32 = vsub.f32 %v1081_v58, %v1129_v63  ;;  %v3287_v47 = vsub.f32 %v2995_v11, %v3002_v62 }
 0x3cd   :  { %v1115_v1 = vpop.xlane.xlu0 %1114  ;;  %v3034_v0 = vpop.eup %2341  ;;  %2355 = vpow2.f32 %v1314_v48 }
 0x3ce   :  { %v3015_v17 = vmax.f32 %v3004_v23, %v1115_v1  ;;  %v3040_v33 = vpop.eup %2343  ;;  %2357 = vpow2.f32 %v1310_v55  ;;  %v1318_v21 = vmul.f32 1.442695, %v1289_v32  ;;  %v1320_v56 = vmul.f32 1.442695, %v3287_v47 }
 0x3d0   :  { %1685 = vst.msk [vmem:[#allocation4 + $0x78] sm:$0xff] %vm3282_vm0, %v3015_v17  ;;  %1444 = vperm.xlu0 %2307, %v3017_v43   ;;  %1209 = vperm.xlu1 %2308, %v3015_v17   ;;  %2359 = vpow2.f32 %v1318_v21  ;;  %vm1944_vm0 = vmpackc.low %vm1037_vm3, %vm1036_vm1 }
 0x3d4   :  { %1459 = vperm.xlu0 %2307, %v3028_v52   ;;  %1439 = vperm.xlu1 %2308, %v3025_v3  }
 0x3d5   :  { %v3042_v42 = vpop.eup %2345 }
 0x3d6   :  { %v3046_v54 = vpop.eup %2347 }
 0x3d7   :  { %v3048_v28 = vpop.eup %2349 }
 0x3d8   :  { %1469 = vperm.xlu0 %2307, %v3034_v0   ;;  %1449 = vperm.xlu1 %2308, %v3032_v53   ;;  %v3052_v61 = vpop.eup %2351 }
 0x3d9   :  { %v3054_v58 = vpop.eup %2353 }
 0x3da   :  { %v3058_v63 = vpop.eup %2355 }
 0x3db   :  { %v3061_v4 = vpop.eup %2357 }
 0x3dc   :  { %1489 = vperm.xlu0 %2307, %v3042_v42   ;;  %1454 = vperm.xlu1 %2308, %v3040_v33  }
 0x3dd   :  { %v3064_v13 = vpop.eup %2359 }
 0x3de   :  { %3283 = vst [vmem:[#allocation18_spill] sm:$0xff] %v3064_v13 }
 0x3e0   :  { %1479 = vperm.xlu0 %2307, %v3048_v28   ;;  %1474 = vperm.xlu1 %2308, %v3046_v54  }
 0x3e4   :  { %1499 = vperm.xlu0 %2307, %v3054_v58   ;;  %1464 = vperm.xlu1 %2308, %v3052_v61  }
 0x3e8   :  { %1494 = vperm.xlu1 %2308, %v3058_v63  }
 0x3ec   :  { %1484 = vperm.xlu1 %2308, %v3061_v4  }
 0x3f0   :  { %1504 = vperm.xlu1 %2308, %v3064_v13  }
 0x42b   :  { %v1135_v1 = vpop.permute.xlu1 %1134 }
 0x42c   :  { %v1212_v49 = vsub.f32 %v2808_v15, %v1135_v1 }
 0x42e   :  { %v1228_v26 = vmul.f32 1.442695, %v1212_v49 }
 0x42f   :  { %v1145_v39 = vpop.permute.xlu1 %1144  ;;  %v1140_v44 = vpop.permute.xlu0 %1139 }
 0x430   :  { %v1214_v46 = vsub.f32 %v2820_v19, %v1145_v39  ;;  %v1213_v16 = vsub.f32 %v2825_v20, %v1140_v44  ;;  %2361 = vpow2.f32 %v1228_v26 }
 0x432   :  { %v1232_v48 = vmul.f32 1.442695, %v1214_v46  ;;  %v1230_v55 = vmul.f32 1.442695, %v1213_v16 }
 0x433   :  { %v1150_v32 = vpop.permute.xlu1 %1149  ;;  %v1155_v21 = vpop.permute.xlu0 %1154 }
 0x434   :  { %2363 = vpow2.f32 %v1232_v48  ;;  %v1215_v2 = vsub.f32 %v2838_v24, %v1150_v32  ;;  %v1216_v37 = vsub.f32 %v2843_v25, %v1155_v21 }
 0x435   :  { %2365 = vpow2.f32 %v1230_v55 }
 0x436   :  { %v1234_v13 = vmul.f32 1.442695, %v1215_v2  ;;  %v1236_v15 = vmul.f32 1.442695, %v1216_v37 }
 0x437   :  { %v1160_v1 = vpop.permute.xlu1 %1159  ;;  %v1165_v49 = vpop.permute.xlu0 %1164 }
 0x438   :  { %2367 = vpow2.f32 %v1234_v13  ;;  %v1217_v19 = vsub.f32 %v2863_v31, %v1160_v1  ;;  %v1218_v20 = vsub.f32 %v2858_v30, %v1165_v49 }
 0x439   :  { %2369 = vpow2.f32 %v1236_v15 }
 0x43a   :  { %v1238_v39 = vmul.f32 1.442695, %v1217_v19  ;;  %v1240_v44 = vmul.f32 1.442695, %v1218_v20 }
 0x43b   :  { %v1170_v26 = vpop.permute.xlu1 %1169  ;;  %v1175_v46 = vpop.permute.xlu0 %1174 }
 0x43c   :  { %2371 = vpow2.f32 %v1238_v39  ;;  %v1219_v24 = vsub.f32 %v2876_v35, %v1170_v26  ;;  %v1220_v25 = vsub.f32 %v2881_v36, %v1175_v46 }
 0x43d   :  { %2373 = vpow2.f32 %v1240_v44  ;;  %v2362_v13 = vpop.eup %2361 }
 0x43e   :  { %v1242_v2 = vmul.f32 1.442695, %v1219_v24  ;;  %v1244_v37 = vmul.f32 1.442695, %v1220_v25  ;;  %v1260_v26 = vsel %vm1036_vm1, %v2362_v13, 0.0  ;;  %vm1953_vm1 = vmpackc.low %vm1043_vm8, %vm1042_vm7 }
 0x43f   :  { %v1180_v16 = vpop.permute.xlu1 %1179  ;;  %v1185_v48 = vpop.permute.xlu0 %1184 }
 0x440   :  { %2375 = vpow2.f32 %v1242_v2  ;;  %v1221_v31 = vsub.f32 %v2899_v41, %v1180_v16  ;;  %v1222_v30 = vsub.f32 %v2894_v40, %v1185_v48 }
 0x441   :  { %v2364_v55 = vpop.eup %2363  ;;  %2377 = vpow2.f32 %v1244_v37 }
 0x442   :  { %v2366_v32 = vpop.eup %2365  ;;  %v1246_v21 = vmul.f32 1.442695, %v1221_v31  ;;  %v1248_v15 = vmul.f32 1.442695, %v1222_v30  ;;  %v1262_v35 = vsel %vm1038_vm2, %v2364_v55, 0.0 }
 0x443   :  { %v1190_v36 = vpop.permute.xlu1 %1189  ;;  %1360 = vadd.xlane.f32.xlu0 %v1262_v35  ;;  %v1261_v1 = vsel %vm1037_vm3, %v2366_v32, 0.0  ;;  %v1195_v49 = vpop.permute.xlu0 %1194  ;;  %v1945_v19 = vpack.c.bf16 %v2366_v32, %v2362_v13  ;;  %vm1947_vm3 = vmpackc.low %vm1039_vm4, %vm1038_vm2 }
 0x444   :  { %2379 = vpow2.f32 %v1246_v21  ;;  %v1223_v40 = vsub.f32 %v2914_v50, %v1190_v36  ;;  %1358 = vadd.xlane.f32.xlu1 %v1261_v1  ;;  %v1224_v41 = vsub.f32 %v2919_v51, %v1195_v49  ;;  %vm1956_vm2 = vmpackc.low %vm1045_vm10, %vm1044_vm9 }
 0x445   :  { %v2368_v20 = vpop.eup %2367  ;;  %2381 = vpow2.f32 %v1248_v15  ;;  %2256 = vmatprep.mubr.msk.bf16.mxu1 %vm1944_vm0, %v1945_v19  ;;  %vm1950_vm0 = vmpackc.low %vm1041_vm6, %vm1040_vm5 }
 0x446   :  { %v1948_v39 = vpack.c.bf16 %v2368_v20, %v2364_v55  ;;  %v1250_v44 = vmul.f32 1.442695, %v1223_v40  ;;  %v1252_v7 = vmul.f32 1.442695, %v1224_v41  ;;  %v2370_v46 = vpop.eup %2369  ;;  %v1263_v6 = vsel %vm1039_vm4, %v2368_v20, 0.0  ;;  %vm1959_vm4 = vmpackc.low %vm1047_vm12, %vm1046_vm11 }
 0x447   :  { %1356 = vadd.xlane.f32.xlu0 %v1260_v26  ;;  %v1200_v50 = vpop.permute.xlu1 %1199  ;;  %v1205_v51 = vpop.permute.xlu0 %1204 }
 0x448   :  { %2383 = vpow2.f32 %v1250_v44  ;;  %v1225_v24 = vsub.f32 %v2937_v59, %v1200_v50  ;;  %v1226_v25 = vsub.f32 %v2932_v57, %v1205_v51  ;;  %2257 = vmatmul.mubr.msk.bf16.vlgmr.msra.gmra.mxu1 %vm1947_vm3, %v1948_v39  ;;  %v3285_v39 = vsub.f32 %v3004_v23, %v3015_v17 }
 0x449   :  { %v2372_v5 = vpop.eup %2371  ;;  %2385 = vpow2.f32 %v1252_v7 }
 0x44a   :  { %v2374_v2 = vpop.eup %2373  ;;  %v1254_v37 = vmul.f32 1.442695, %v1225_v24  ;;  %v1256_v16 = vmul.f32 1.442695, %v1226_v25  ;;  %v1951_v48 = vpack.c.bf16 %v2372_v5, %v2370_v46  ;;  %v1265_v35 = vsel %vm1041_vm6, %v2372_v5, 0.0 }
 0x44b   :  { %1362 = vadd.xlane.f32.xlu0 %v1263_v6  ;;  %v1210_v57 = vpop.permute.xlu1 %1209  ;;  %v1266_v59 = vsel %vm1042_vm7, %v2374_v2, 0.0  ;;  %vm1965_vm7 = vmpackc.low %vm1051_vm13, %vm1050_vm15  ;;  %v1322_v44 = vmul.f32 1.442695, %v3285_v39 }
 0x44c   :  { %2387 = vpow2.f32 %v1254_v37  ;;  %v1227_v13 = vsub.f32 %v2946_v60, %v1210_v57  ;;  %1368 = vadd.xlane.f32.xlu1 %v1266_v59  ;;  %2260 = vmatprep.mubr.msk.bf16.mxu1 %vm1950_vm0, %v1951_v48  ;;  %v1264_v60 = vsel %vm1040_vm5, %v2370_v46, 0.0  ;;  %vm3284_vm5 = vcmp.eq.s32.totalorder %v2885_v38, %v2797_v10  ;;  %v3195_v10 = vpop.permute.xlu0 %1444  ;;  %v1325_v48 = vld [vmem:[#allocation5 + $0x8] sm:$0xff] }
 0x44d   :  { %v2376_v8 = vpop.eup %2375  ;;  %2389 = vpow2.f32 %v1256_v16  ;;  %vm1962_vm6 = vmpackc.low %vm1049_vm14, %vm3284_vm5  ;;  %v1326_v16 = vld [vmem:[#allocation5 + $0x10] sm:$0xff]  ;;  %v1341_v59 = vmul.f32 %v3017_v43, %v1325_v48 }
 0x44e   :  { %v1258_v31 = vmul.f32 1.442695, %v1227_v13  ;;  %v1267_v30 = vsel %vm1043_vm8, %v2376_v8, 0.0  ;;  %v1954_v55 = vpack.c.bf16 %v2376_v8, %v2374_v2  ;;  %v2378_v32 = vpop.eup %2377  ;;  %vm3286_vm8 = vmmov %vm3284_vm5  ;;  %v1342_v57 = vmul.f32 %v3032_v53, %v1326_v16  ;;  %v1324_v8 = vld [vmem:[#allocation5] sm:$0xff]  ;;  %v1338_v48 = vld [vmem:[#allocation5 + $0x70] sm:$0xff] }
 0x44f   :  { %1370 = vadd.xlane.f32.xlu0 %v1267_v30  ;;  %v1268_v1 = vsel %vm1044_vm9, %v2378_v32, 0.0  ;;  %v3191_v38 = vpop.permute.xlu1 %1439  ;;  %vm3288_vm9 = vcmask 7168  }
 0x450   :  { %2391 = vpow2.f32 %v1258_v31  ;;  %1364 = vadd.xlane.f32.xlu1 %v1264_v60  ;;  %2261 = vmatmul.mubr.msk.bf16.gmra.mxu1 %vm1953_vm1, %v1954_v55  ;;  %v3199_v51 = vpop.permute.xlu0 %1459  ;;  %v1340_v60 = vmul.f32 %v3025_v3, %v1324_v8  ;;  %vm3295_vm3 = vmmov %vm3288_vm9 }
 0x451   :  { %v2380_v21 = vpop.eup %2379  ;;  %2393 = vpow2.f32 %v1322_v44  ;;  %v1332_v44 = vld [vmem:[#allocation5 + $0x40] sm:$0xff]  ;;  %vm3296_vm0 = vmmov %vm3295_vm3 }
 0x452   :  { %v2382_v15 = vpop.eup %2381  ;;  %v1957_v14 = vpack.c.bf16 %v2380_v21, %v2378_v32  ;;  %v1269_v41 = vsel %vm1045_vm10, %v2380_v21, 0.0  ;;  %2395 = vpow2.f32 %v1320_v56  ;;  %vm3289_vm10 = vmmov %vm3288_vm9  ;;  %v1327_v21 = vld [vmem:[#allocation5 + $0x18] sm:$0xff] }
 0x453   :  { %1366 = vadd.xlane.f32.xlu0 %v1265_v35  ;;  %v1270_v9 = vsel %vm1046_vm11, %v2382_v15, 0.0  ;;  %v3193_v50 = vpop.permute.xlu1 %1449  ;;  %v1330_v35 = vld [vmem:[#allocation5 + $0x30] sm:$0xff]  ;;  %vm3290_vm11 = vmmov %vm3288_vm9  ;;  %v1343_v53 = vmul.f32 %v3040_v33, %v1327_v21 }
 0x454   :  { %1376 = vadd.xlane.f32.xlu1 %v1270_v9  ;;  %2264 = vmatprep.mubr.msk.bf16.mxu1 %vm1956_vm2, %v1957_v14  ;;  %v3203_v62 = vpop.permute.xlu0 %1469  ;;  %v1346_v43 = vmul.f32 %v3034_v0, %v1330_v35  ;;  %v1331_v9 = vld [vmem:[#allocation5 + $0x38] sm:$0xff]  ;;  %vm3297_vm1 = vmmov %vm3296_vm0 }
 0x455   :  { %v2384_v18 = vpop.eup %2383  ;;  %v1347_v3 = vmul.f32 %v3046_v54, %v1331_v9  ;;  %v1335_v54 = vld [vmem:[#allocation5 + $0x58] sm:$0xff]  ;;  %vm3298_vm2 = vmmov %vm3296_vm0  ;;  %v1421_v9 = vld [vmem:[#allocation3 + $0x30] sm:$0xff] }
 0x456   :  { %v1271_v12 = vsel %vm1047_vm12, %v2384_v18, 0.0  ;;  %v1960_v36 = vpack.c.bf16 %v2384_v18, %v2382_v15  ;;  %v2386_v49 = vpop.eup %2385  ;;  %vm3291_vm12 = vmmov %vm3288_vm9 }
 0x457   :  { %1378 = vadd.xlane.f32.xlu0 %v1271_v12  ;;  %v1272_v26 = vsel %vm3286_vm8, %v2386_v49, 0.0  ;;  %v3197_v45 = vpop.permute.xlu1 %1454  ;;  %vm3300_vm5 = vmmov %vm3296_vm0 }
 0x458   :  { %1372 = vadd.xlane.f32.xlu1 %v1268_v1  ;;  %2265 = vmatmul.mubr.msk.bf16.gmra.mxu1 %vm1959_vm4, %v1960_v36  ;;  %v3207_v24 = vpop.permute.xlu0 %1489  ;;  %v1328_v36 = vld [vmem:[#allocation5 + $0x20] sm:$0xff]  ;;  %vm3299_vm4 = vmmov %vm3296_vm0 }
 0x459   :  { %v2388_v19 = vpop.eup %2387  ;;  %vm3304_vm8 = vmmov %vm3296_vm0 }
 0x45a   :  { %v2390_v40 = vpop.eup %2389  ;;  %v1963_v20 = vpack.c.bf16 %v2388_v19, %v2386_v49  ;;  %v1273_v7 = vsel %vm1049_vm14, %v2388_v19, 0.0  ;;  %v1344_v49 = vmul.f32 %v3028_v52, %v1328_v36  ;;  %vm3293_vm14 = vmmov %vm3288_vm9  ;;  %v1517_v36 = vmul.f32 %v3191_v38, %v1421_v9  ;;  %v1428_v38 = vld [vmem:[#allocation3 + $0x48] sm:$0xff] }
 0x45b   :  { %1374 = vadd.xlane.f32.xlu0 %v1269_v41  ;;  %v1274_v22 = vsel %vm1050_vm15, %v2390_v40, 0.0  ;;  %v3201_v11 = vpop.permute.xlu1 %1474  ;;  %vm3294_vm15 = vmmov %vm3288_vm9 }
 0x45c   :  { %1384 = vadd.xlane.f32.xlu1 %v1274_v22  ;;  %2268 = vmatprep.mubr.msk.bf16.mxu1 %vm1962_vm6, %v1963_v20  ;;  %v3211_v5 = vpop.permute.xlu0 %1479  ;;  %v1334_v20 = vld [vmem:[#allocation5 + $0x50] sm:$0xff]  ;;  %vm3301_vm6 = vmmov %vm3296_vm0 }
 0x45d   :  { %v2392_v29 = vpop.eup %2391 }
 0x45e   :  { %v1275_v27 = vsel %vm1051_vm13, %v2392_v29, 0.0  ;;  %v1966_v34 = vpack.c.bf16 %v2392_v29, %v2390_v40  ;;  %v3185_v23 = vpop.eup %2393  ;;  %vm3292_vm13 = vmmov %vm3288_vm9  ;;  %v1329_v40 = vld [vmem:[#allocation5 + $0x28] sm:$0xff]  ;;  %v1350_v29 = vmul.f32 %v3042_v42, %v1334_v20 }
 0x45f   :  { %1386 = vadd.xlane.f32.xlu0 %v1275_v27  ;;  %v3188_v17 = vpop.eup %2395  ;;  %v3205_v46 = vpop.permute.xlu1 %1464  ;;  %v1345_v22 = vmul.f32 %v3052_v61, %v1329_v40  ;;  %v1333_v61 = vld [vmem:[#allocation5 + $0x48] sm:$0xff] }
 0x460   :  { %1380 = vadd.xlane.f32.xlu1 %v1272_v26  ;;  %2269 = vmatmul.mubr.msk.bf16.gmra.mxu1 %vm1965_vm7, %v1966_v34  ;;  %v3215_v37 = vpop.permute.xlu0 %1499  ;;  %v1351_v26 = vmul.f32 %v3058_v63, %v1335_v54  ;;  %v1339_v63 = vld [vmem:[#allocation5 + $0x78] sm:$0xff]  ;;  %vm3303_vm7 = vmmov %vm3296_vm0 }
 0x463   :  { %1382 = vadd.xlane.f32.xlu0 %v1273_v7  ;;  %v3209_v25 = vpop.permute.xlu1 %1494  ;;  %v1348_v7 = vmul.f32 %v3048_v28, %v1332_v44 }
 0x467   :  { %v3213_v2 = vpop.permute.xlu1 %1484 }
 0x46b   :  { %v3217_v6 = vpop.permute.xlu1 %1504 }
 0x471   :  { %1514 = vperm.xlu1 %2308, %v3185_v23  }
 0x479   :  { %1509 = vperm.xlu0 %2307, %v3188_v17  }
 0x4cc   :  { %v1361_v13 = vpop.xlane.xlu0 %1360 }
 0x4cd   :  { %v1359_v31 = vpop.xlane.xlu1 %1358  ;;  %v1390_v30 = vadd.f32 %v1361_v13, %v1342_v57  ;;  %v1349_v57 = vmul.f32 %v3061_v4, %v1333_v61  ;;  %v1337_v4 = vld [vmem:[#allocation5 + $0x68] sm:$0xff]  ;;  %v1429_v61 = vld [vmem:[#allocation3 + $0x40] sm:$0xff] }
 0x4ce   :  { %v1389_v55 = vadd.f32 %v1359_v31, %v1341_v59  ;;  %v1354_v59 = vmul.f32 %v3188_v17, %v1338_v48  ;;  %v3302_v17 = vld [vmem:[#allocation18_spill] sm:$0xff]  ;;  %v1432_v48 = vld [vmem:[#allocation3 + $0x38] sm:$0xff] }
 0x4cf   :  { %1407 = vst.msk [vmem:[#allocation5 + $0x10] sm:$0xff] %vm3288_vm9, %v1390_v30  ;;  %v1336_v30 = vld [vmem:[#allocation5 + $0x60] sm:$0xff] }
 0x4d0   :  { %1406 = vst.msk [vmem:[#allocation5 + $0x8] sm:$0xff] %vm3289_vm10, %v1389_v55  ;;  %v1357_v32 = vpop.xlane.xlu0 %1356  ;;  %v1355_v55 = vmul.f32 %v3185_v23, %v1339_v63  ;;  %v1423_v23 = vld [vmem:[#allocation3 + $0x58] sm:$0xff]  ;;  %v1528_v63 = vmul.f32 %v3209_v25, %v1432_v48 }
 0x4d1   :  { %v1388_v15 = vadd.f32 %v1357_v32, %v1340_v60  ;;  %v1352_v60 = vmul.f32 %v3054_v58, %v1336_v30  ;;  %v1424_v58 = vld [vmem:[#allocation3 + $0x18] sm:$0xff] }
 0x4d3   :  { %1405 = vst.msk [vmem:[#allocation5] sm:$0xff] %vm3290_vm11, %v1388_v15 }
 0x4d4   :  { %v1363_v14 = vpop.xlane.xlu0 %1362 }
 0x4d5   :  { %v1369_v18 = vpop.xlane.xlu1 %1368  ;;  %v1391_v12 = vadd.f32 %v1363_v14, %v1343_v53  ;;  %v1353_v53 = vmul.f32 %v3302_v17, %v1337_v4  ;;  %v1436_v4 = vld [vmem:[#allocation3 + $0x28] sm:$0xff]  ;;  %v1434_v17 = vld [vmem:[#allocation3 + $0x70] sm:$0xff] }
 0x4d6   :  { %v1394_v1 = vadd.f32 %v1369_v18, %v1346_v43  ;;  %v1519_v18 = vmul.f32 %v3193_v50, %v1423_v23  ;;  %v1530_v23 = vmul.f32 %v3217_v6, %v1434_v17 }
 0x4d7   :  { %1408 = vst.msk [vmem:[#allocation5 + $0x18] sm:$0xff] %vm3291_vm12, %v1391_v12 }
 0x4d8   :  { %1411 = vst.msk [vmem:[#allocation5 + $0x30] sm:$0xff] %vm3292_vm13, %v1394_v1  ;;  %v1371_v19 = vpop.xlane.xlu0 %1370 }
 0x4d9   :  { %v1365_v41 = vpop.xlane.xlu1 %1364  ;;  %v1395_v33 = vadd.f32 %v1371_v19, %v1347_v3  ;;  %v1422_v3 = vld [vmem:[#allocation3] sm:$0xff]  ;;  %v1520_v19 = vmul.f32 %v3197_v45, %v1424_v58 }
 0x4da   :  { %v1392_v0 = vadd.f32 %v1365_v41, %v1344_v49  ;;  %v1427_v41 = vld [vmem:[#allocation3 + $0x8] sm:$0xff]  ;;  %v1518_v20 = vmul.f32 %v3195_v10, %v1422_v3 }
 0x4db   :  { %1412 = vst.msk [vmem:[#allocation5 + $0x38] sm:$0xff] %vm3293_vm14, %v1395_v33  ;;  %v1523_v50 = vmul.f32 %v3203_v62, %v1427_v41 }
 0x4dc   :  { %1409 = vst.msk [vmem:[#allocation5 + $0x20] sm:$0xff] %vm3294_vm15, %v1392_v0  ;;  %v1367_v27 = vpop.xlane.xlu0 %1366 }
 0x4dd   :  { %v1377_v34 = vpop.xlane.xlu1 %1376  ;;  %v1393_v39 = vadd.f32 %v1367_v27, %v1345_v22  ;;  %v1425_v22 = vld [vmem:[#allocation3 + $0x50] sm:$0xff] }
 0x4de   :  { %v1398_v52 = vadd.f32 %v1377_v34, %v1350_v29  ;;  %v1521_v34 = vmul.f32 %v3199_v51, %v1425_v22 }
 0x4df   :  { %1410 = vst.msk [vmem:[#allocation5 + $0x28] sm:$0xff] %vm3295_vm3, %v1393_v39  ;;  %v1426_v39 = vld [vmem:[#allocation3 + $0x68] sm:$0xff] }
 0x4e0   :  { %1415 = vst.msk [vmem:[#allocation5 + $0x50] sm:$0xff] %vm3296_vm0, %v1398_v52  ;;  %v1379_v47 = vpop.xlane.xlu0 %1378  ;;  %v1524_v52 = vmul.f32 %v3201_v11, %v1428_v38 }
 0x4e1   :  { %v1373_v56 = vpop.xlane.xlu1 %1372  ;;  %v1399_v16 = vadd.f32 %v1379_v47, %v1351_v26  ;;  %v1431_v26 = vld [vmem:[#allocation3 + $0x10] sm:$0xff]  ;;  %v1522_v47 = vmul.f32 %v3205_v46, %v1426_v39 }
 0x4e2   :  { %v1396_v42 = vadd.f32 %v1373_v56, %v1348_v7 }
 0x4e3   :  { %1416 = vst.msk [vmem:[#allocation5 + $0x58] sm:$0xff] %vm3297_vm1, %v1399_v16  ;;  %v1527_v16 = vmul.f32 %v3207_v24, %v1431_v26 }
 0x4e4   :  { %1413 = vst.msk [vmem:[#allocation5 + $0x40] sm:$0xff] %vm3298_vm2, %v1396_v42  ;;  %v1375_v13 = vpop.xlane.xlu0 %1374 }
 0x4e5   :  { %v1385_v8 = vpop.xlane.xlu1 %1384  ;;  %v1397_v31 = vadd.f32 %v1375_v13, %v1349_v57  ;;  %v1525_v57 = vmul.f32 %v3211_v5, %v1429_v61 }
 0x4e6   :  { %v1402_v28 = vadd.f32 %v1385_v8, %v1354_v59  ;;  %v1430_v59 = vld [vmem:[#allocation3 + $0x20] sm:$0xff]  ;;  %v1435_v8 = vld [vmem:[#allocation3 + $0x78] sm:$0xff] }
 0x4e7   :  { %1414 = vst.msk [vmem:[#allocation5 + $0x48] sm:$0xff] %vm3299_vm4, %v1397_v31 }
 0x4e8   :  { %1419 = vst.msk [vmem:[#allocation5 + $0x70] sm:$0xff] %vm3300_vm5, %v1402_v28  ;;  %v1387_v32 = vpop.xlane.xlu0 %1386  ;;  %v1526_v28 = vmul.f32 %v3213_v2, %v1430_v59 }
 0x4e9   :  { %v1381_v21 = vpop.xlane.xlu1 %1380  ;;  %v1403_v15 = vadd.f32 %v1387_v32, %v1355_v55  ;;  %v1433_v55 = vld [vmem:[#allocation3 + $0x60] sm:$0xff] }
 0x4ea   :  { %v1400_v35 = vadd.f32 %v1381_v21, %v1352_v60 }
 0x4eb   :  { %1420 = vst.msk [vmem:[#allocation5 + $0x78] sm:$0xff] %vm3301_vm6, %v1403_v15 }
 0x4ec   :  { %1417 = vst.msk [vmem:[#allocation5 + $0x60] sm:$0xff] %vm3303_vm7, %v1400_v35  ;;  %v1383_v43 = vpop.xlane.xlu0 %1382  ;;  %v1529_v35 = vmul.f32 %v3215_v37, %v1433_v55 }
 0x4ed   :  { %v1401_v14 = vadd.f32 %v1383_v43, %v1353_v53  ;;  %v1515_v21 = vpop.permute.xlu1 %1514 }
 0x4ee   :  { %v1532_v43 = vmul.f32 %v1515_v21, %v1436_v4 }
 0x4ef   :  { %1418 = vst.msk [vmem:[#allocation5 + $0x68] sm:$0xff] %vm3304_vm8, %v1401_v14 }
 0x4f4   :  { %v1510_v31 = vpop.permute.xlu0 %1509 }
 0x4f5   :  { %v1531_v32 = vmul.f32 %v1510_v31, %v1435_v8 }
 0x508   :  { %v2258_v12 = vpop.f32.mrf.mxu1 }
 0x509   :  { %v1640_v1 = vadd.f32 %v2258_v12, %v1519_v18 }
 0x50a   :  { %v1575_v49 = vpop.f32.mrf.mxu1 }
 0x50b   :  { %1656 = vst [vmem:[#allocation3 + $0x58] sm:$0xff] %v1640_v1  ;;  %v1638_v40 = vadd.f32 %v1575_v49, %v1517_v36 }
 0x50c   :  { %v2259_v33 = vpop.f32.mrf.mxu1 }
 0x50d   :  { %1654 = vst [vmem:[#allocation3 + $0x30] sm:$0xff] %v1638_v40  ;;  %v1641_v0 = vadd.f32 %v2259_v33, %v1520_v19 }
 0x50e   :  { %v1578_v29 = vpop.f32.mrf.mxu1 }
 0x50f   :  { %1657 = vst [vmem:[#allocation3 + $0x18] sm:$0xff] %v1641_v0  ;;  %v1639_v27 = vadd.f32 %v1578_v29, %v1518_v20 }
 0x510   :  { %v2262_v54 = vpop.f32.mrf.mxu1 }
 0x511   :  { %1655 = vst [vmem:[#allocation3] sm:$0xff] %v1639_v27  ;;  %v1644_v45 = vadd.f32 %v2262_v54, %v1523_v50 }
 0x512   :  { %v1591_v44 = vpop.f32.mrf.mxu1 }
 0x513   :  { %1660 = vst [vmem:[#allocation3 + $0x8] sm:$0xff] %v1644_v45  ;;  %v1642_v10 = vadd.f32 %v1591_v44, %v1521_v34 }
 0x514   :  { %v2263_v7 = vpop.f32.mrf.mxu1 }
 0x515   :  { %1658 = vst [vmem:[#allocation3 + $0x50] sm:$0xff] %v1642_v10  ;;  %v1645_v62 = vadd.f32 %v2263_v7, %v1524_v52 }
 0x516   :  { %v1594_v56 = vpop.f32.mrf.mxu1 }
 0x517   :  { %1661 = vst [vmem:[#allocation3 + $0x48] sm:$0xff] %v1645_v62  ;;  %v1643_v51 = vadd.f32 %v1594_v56, %v1522_v47 }
 0x518   :  { %v2266_v42 = vpop.f32.mrf.mxu1 }
 0x519   :  { %1659 = vst [vmem:[#allocation3 + $0x68] sm:$0xff] %v1643_v51  ;;  %v1648_v11 = vadd.f32 %v2266_v42, %v1527_v16 }
 0x51a   :  { %v1607_v13 = vpop.f32.mrf.mxu1 }
 0x51b   :  { %1664 = vst [vmem:[#allocation3 + $0x10] sm:$0xff] %v1648_v11  ;;  %v1646_v46 = vadd.f32 %v1607_v13, %v1525_v57 }
 0x51c   :  { %v2267_v30 = vpop.f32.mrf.mxu1 }
 0x51d   :  { %1662 = vst [vmem:[#allocation3 + $0x40] sm:$0xff] %v1646_v46  ;;  %v1649_v24 = vadd.f32 %v2267_v30, %v1528_v63 }
 0x51e   :  { %v1610_v60 = vpop.f32.mrf.mxu1 }
 0x51f   :  { %1665 = vst [vmem:[#allocation3 + $0x38] sm:$0xff] %v1649_v24  ;;  %v1647_v5 = vadd.f32 %v1610_v60, %v1526_v28 }
 0x520   :  { %v2270_v15 = vpop.f32.mrf.mxu1 }
 0x521   :  { %1663 = vst [vmem:[#allocation3 + $0x20] sm:$0xff] %v1647_v5  ;;  %v1652_v25 = vadd.f32 %v2270_v15, %v1531_v32 }
 0x522   :  { %v1623_v53 = vpop.f32.mrf.mxu1 }
 0x523   :  { %1668 = vst [vmem:[#allocation3 + $0x78] sm:$0xff] %v1652_v25  ;;  %v1650_v14 = vadd.f32 %v1623_v53, %v1529_v35 }
 0x524   :  { %v2271_v2 = vpop.f32.mrf.mxu1 }
 0x525   :  { %1666 = vst [vmem:[#allocation3 + $0x60] sm:$0xff] %v1650_v14  ;;  %v1653_v9 = vadd.f32 %v2271_v2, %v1532_v43 }
 0x526   :  { %v1626_v18 = vpop.f32.mrf.mxu1 }
 0x527   :  { %1669 = vst [vmem:[#allocation3 + $0x28] sm:$0xff] %v1653_v9  ;;  %v1651_v58 = vadd.f32 %v1626_v18, %v1530_v23 }
 0x529   :  { %1667 = vst [vmem:[#allocation3 + $0x70] sm:$0xff] %v1651_v58 }
 0x52a PF:  { %v1691_v12 = vld [vmem:[#allocation5 + $0x10] sm:$0xff]  ;;  %v1689_v36 = vld [vmem:[#allocation5] sm:$0xff]  ;;  %v1692_v37 = vld [vmem:[#allocation5 + $0x18] sm:$0xff]  ;;  %v2508_v1 = vmov 0   ;;  %s2509_s7 = smov [#allocation14]  }
 0x52b   :  { %2398 = vset.pattern.permute.xlu1 %v2508_v1  ;;  %2397 = vset.pattern.permute.xlu0 %v2508_v1  ;;  %v1707_v3 = vmax.f32 %v1691_v12, 1e-30  ;;  %v1705_v49 = vmax.f32 %v1689_v36, 1e-30  ;;  %v1708_v19 = vmax.f32 %v1692_v37, 1e-30 }
 0x52c   :  { %v1690_v40 = vld [vmem:[#allocation5 + $0x8] sm:$0xff]  ;;  %v1693_v33 = vld [vmem:[#allocation5 + $0x20] sm:$0xff]  ;;  %v1696_v22 = vld [vmem:[#allocation5 + $0x38] sm:$0xff]  ;;  %s1870_s11 = sshll.u32 %s2509_s7, 4  ;;  %s1871_s11 = int_to_ptr.vmem [resolvable:$true] %s1870_s11 }
 0x52d   :  { %v1694_v41 = vld [vmem:[#allocation5 + $0x28] sm:$0xff]  ;;  %2399 = vrcp.f32 %v1707_v3  ;;  %v1706_v6 = vmax.f32 %v1690_v40, 1e-30  ;;  %v1709_v0 = vmax.f32 %v1693_v33, 1e-30  ;;  %v1695_v29 = vld [vmem:[#allocation5 + $0x30] sm:$0xff]  ;;  %p2478_p4 = scmp.lt.s32.totalorder %s1871_s11, %s1871_s11 }
 0x52e   :  { %2401 = vrcp.f32 %v1705_v49  ;;  %v1710_v20 = vmax.f32 %v1694_v41, 1e-30  ;;  %v1712_v50 = vmax.f32 %v1696_v22, 1e-30  ;;  %v1711_v27 = vmax.f32 %v1695_v29, 1e-30 }
 0x52f   :  { %2403 = vrcp.f32 %v1708_v19  ;;  %v1698_v38 = vld [vmem:[#allocation5 + $0x48] sm:$0xff]  ;;  %v1697_v54 = vld [vmem:[#allocation5 + $0x40] sm:$0xff]  ;;  %v1700_v39 = vld [vmem:[#allocation5 + $0x58] sm:$0xff]  ;;  %s2473_s16 = scalar_lea.vmem %s1871_s11, 2048 }
 0x530   :  { %2405 = vrcp.f32 %v1706_v6  ;;  %v1714_v34 = vmax.f32 %v1698_v38, 1e-30  ;;  %v1713_v45 = vmax.f32 %v1697_v54, 1e-30  ;;  %v1699_v44 = vld [vmem:[#allocation5 + $0x50] sm:$0xff]  ;;  %v1702_v62 = vld [vmem:[#allocation5 + $0x68] sm:$0xff]  ;;  %p2474_p3 = scmp.ne.s32.totalorder %s1871_s11, %s2473_s16  ;;  %p2479_p5 = scmp.lt.s32.totalorder %s2473_s16, %s2473_s16 }
 0x531   :  { %2407 = vrcp.f32 %v1710_v20  ;;  %v1716_v26 = vmax.f32 %v1700_v39, 1e-30  ;;  %v1715_v47 = vmax.f32 %v1699_v44, 1e-30  ;;  %v1701_v56 = vld [vmem:[#allocation5 + $0x60] sm:$0xff]  ;;  %v1704_v42 = vld [vmem:[#allocation5 + $0x78] sm:$0xff] }
 0x532   :  { %2409 = vrcp.f32 %v1709_v0  ;;  %v1718_v16 = vmax.f32 %v1702_v62, 1e-30  ;;  %v1717_v48 = vmax.f32 %v1701_v56, 1e-30  ;;  %v1703_v11 = vld [vmem:[#allocation5 + $0x70] sm:$0xff]  ;;  %v1739_v5 = vld [vmem:[#allocation3 + $0x58] sm:$0xff]  ;;  %p2480_p6 = por %p2479_p5, %p2478_p4 }
 0x533   :  { %2411 = vrcp.f32 %v1712_v50  ;;  %v1720_v59 = vmax.f32 %v1704_v42, 1e-30  ;;  %v1719_v63 = vmax.f32 %v1703_v11, 1e-30  ;;  %v1737_v4 = vld [vmem:[#allocation3 + $0x30] sm:$0xff]  ;;  %v1740_v17 = vld [vmem:[#allocation3 + $0x18] sm:$0xff] }
 0x534   :  { %2413 = vrcp.f32 %v1711_v27  ;;  %v1738_v53 = vld [vmem:[#allocation3] sm:$0xff]  ;;  %v1742_v9 = vld [vmem:[#allocation3 + $0x68] sm:$0xff]  ;;  %v1741_v18 = vld [vmem:[#allocation3 + $0x50] sm:$0xff]  ;;  %p2481_p7 = pnand %p2480_p6, %p2474_p3 }
 0x535   :  { %2415 = vrcp.f32 %v1714_v34  ;;  %v1744_v1 = vld [vmem:[#allocation3 + $0x48] sm:$0xff]  ;;  %v1746_v6 = vld [vmem:[#allocation3 + $0x20] sm:$0xff]  ;;  %v1748_v50 = vld [vmem:[#allocation3 + $0x38] sm:$0xff] }
 0x536   :  { %2417 = vrcp.f32 %v1713_v45  ;;  %v1743_v3 = vld [vmem:[#allocation3 + $0x8] sm:$0xff]  ;;  %v1745_v33 = vld [vmem:[#allocation3 + $0x40] sm:$0xff]  ;;  %v1747_v27 = vld [vmem:[#allocation3 + $0x10] sm:$0xff] }
 0x537   :  { %2419 = vrcp.f32 %v1716_v26  ;;  %v1750_v39 = vld [vmem:[#allocation3 + $0x70] sm:$0xff]  ;;  %v1749_v44 = vld [vmem:[#allocation3 + $0x60] sm:$0xff]  ;;  %v1751_v62 = vld [vmem:[#allocation3 + $0x78] sm:$0xff] }
 0x538   :  { %2421 = vrcp.f32 %v1715_v47  ;;  %v1752_v47 = vld [vmem:[#allocation3 + $0x28] sm:$0xff] }
 0x539   :  { %2423 = vrcp.f32 %v1718_v16 }
 0x53a   :  { %v2400_v52 = vpop.eup %2399  ;;  %2425 = vrcp.f32 %v1717_v48 }
 0x53b   :  { %v2402_v10 = vpop.eup %2401  ;;  %1765 = vperm.xlu1 %2398, %v2400_v52   ;;  %2427 = vrcp.f32 %v1720_v59 }
 0x53c   :  { %v2404_v7 = vpop.eup %2403  ;;  %1755 = vperm.xlu0 %2397, %v2402_v10   ;;  %2429 = vrcp.f32 %v1719_v63 }
 0x53d   :  { %v2406_v61 = vpop.eup %2405 }
 0x53e   :  { %v2408_v51 = vpop.eup %2407 }
 0x53f   :  { %1770 = vperm.xlu1 %2398, %v2404_v7   ;;  %v2410_v57 = vpop.eup %2409 }
 0x540   :  { %1760 = vperm.xlu0 %2397, %v2406_v61   ;;  %v2412_v13 = vpop.eup %2411 }
 0x541   :  { %v2414_v46 = vpop.eup %2413 }
 0x542   :  { %v2416_v8 = vpop.eup %2415 }
 0x543   :  { %1780 = vperm.xlu1 %2398, %v2408_v51   ;;  %v2418_v31 = vpop.eup %2417 }
 0x544   :  { %1775 = vperm.xlu0 %2397, %v2410_v57   ;;  %v2420_v30 = vpop.eup %2419 }
 0x545   :  { %v2422_v28 = vpop.eup %2421 }
 0x546   :  { %v2424_v24 = vpop.eup %2423 }
 0x547   :  { %1790 = vperm.xlu1 %2398, %v2412_v13   ;;  %v2426_v55 = vpop.eup %2425 }
 0x548   :  { %1785 = vperm.xlu0 %2397, %v2414_v46   ;;  %v2428_v60 = vpop.eup %2427 }
 0x549   :  { %v2430_v32 = vpop.eup %2429 }
 0x54b   :  { %1800 = vperm.xlu1 %2398, %v2416_v8  }
 0x54c   :  { %1795 = vperm.xlu0 %2397, %v2418_v31  }
 0x54f   :  { %1810 = vperm.xlu1 %2398, %v2420_v30  }
 0x550   :  { %1805 = vperm.xlu0 %2397, %v2422_v28  }
 0x553   :  { %1820 = vperm.xlu1 %2398, %v2424_v24  }
 0x554   :  { %1815 = vperm.xlu0 %2397, %v2426_v55  }
 0x557   :  { %1830 = vperm.xlu1 %2398, %v2428_v60  }
 0x558   :  { %1825 = vperm.xlu0 %2397, %v2430_v32  }
 0x5b6   :  { %v1766_v21 = vpop.permute.xlu1 %1765 }
 0x5b7   :  { %v1835_v15 = vmul.f32 %v1766_v21, %v1739_v5  ;;  %v1756_v35 = vpop.permute.xlu0 %1755 }
 0x5b8   :  { %v1833_v25 = vmul.f32 %v1756_v35, %v1737_v4 }
 0x5b9   :  { %1851 = vst [vmem:[#allocation14 + $0x10] sm:$0xff] %v1835_v15 }
 0x5ba   :  { %1849 = vst [vmem:[#allocation14] sm:$0xff] %v1833_v25  ;;  %v1771_v43 = vpop.permute.xlu1 %1770 }
 0x5bb   :  { %v1836_v14 = vmul.f32 %v1771_v43, %v1740_v17  ;;  %v1761_v2 = vpop.permute.xlu0 %1760 }
 0x5bc   :  { %v1834_v23 = vmul.f32 %v1761_v2, %v1738_v53 }
 0x5bd   :  { %1852 = vst [vmem:[#allocation14 + $0x18] sm:$0xff] %v1836_v14 }
 0x5be   :  { %1850 = vst [vmem:[#allocation14 + $0x8] sm:$0xff] %v1834_v23  ;;  %v1781_v58 = vpop.permute.xlu1 %1780 }
 0x5bf   :  { %v1838_v12 = vmul.f32 %v1781_v58, %v1742_v9  ;;  %v1776_v36 = vpop.permute.xlu0 %1775 }
 0x5c0   :  { %v1837_v37 = vmul.f32 %v1776_v36, %v1741_v18 }
 0x5c1   :  { %1854 = vst [vmem:[#allocation14 + $0x28] sm:$0xff] %v1838_v12 }
 0x5c2   :  { %1853 = vst [vmem:[#allocation14 + $0x20] sm:$0xff] %v1837_v37  ;;  %v1791_v49 = vpop.permute.xlu1 %1790 }
 0x5c3   :  { %v1840_v19 = vmul.f32 %v1791_v49, %v1744_v1  ;;  %v1786_v40 = vpop.permute.xlu0 %1785 }
 0x5c4   :  { %v1839_v41 = vmul.f32 %v1786_v40, %v1743_v3 }
 0x5c5   :  { %1856 = vst [vmem:[#allocation14 + $0x38] sm:$0xff] %v1840_v19 }
 0x5c6   :  { %1855 = vst [vmem:[#allocation14 + $0x30] sm:$0xff] %v1839_v41  ;;  %v1801_v20 = vpop.permute.xlu1 %1800 }
 0x5c7   :  { %v1842_v0 = vmul.f32 %v1801_v20, %v1746_v6  ;;  %v1796_v22 = vpop.permute.xlu0 %1795 }
 0x5c8   :  { %v1841_v29 = vmul.f32 %v1796_v22, %v1745_v33 }
 0x5c9   :  { %1858 = vst [vmem:[#allocation14 + $0x48] sm:$0xff] %v1842_v0 }
 0x5ca   :  { %1857 = vst [vmem:[#allocation14 + $0x40] sm:$0xff] %v1841_v29  ;;  %v1811_v38 = vpop.permute.xlu1 %1810 }
 0x5cb   :  { %v1844_v54 = vmul.f32 %v1811_v38, %v1748_v50  ;;  %v1806_v34 = vpop.permute.xlu0 %1805 }
 0x5cc   :  { %v1843_v45 = vmul.f32 %v1806_v34, %v1747_v27 }
 0x5cd   :  { %1860 = vst [vmem:[#allocation14 + $0x58] sm:$0xff] %v1844_v54 }
 0x5ce   :  { %1859 = vst [vmem:[#allocation14 + $0x50] sm:$0xff] %v1843_v45  ;;  %v1821_v52 = vpop.permute.xlu1 %1820 }
 0x5cf   :  { %v1846_v10 = vmul.f32 %v1821_v52, %v1750_v39  ;;  %v1816_v26 = vpop.permute.xlu0 %1815 }
 0x5d0   :  { %v1845_v7 = vmul.f32 %v1816_v26, %v1749_v44 }
 0x5d1   :  { %1862 = vst [vmem:[#allocation14 + $0x68] sm:$0xff] %v1846_v10 }
 0x5d2   :  { %1861 = vst [vmem:[#allocation14 + $0x60] sm:$0xff] %v1845_v7  ;;  %v1831_v61 = vpop.permute.xlu1 %1830 }
 0x5d3   :  { %v1848_v56 = vmul.f32 %v1831_v61, %v1752_v47  ;;  %v1826_v16 = vpop.permute.xlu0 %1825 }
 0x5d4   :  { %v1847_v51 = vmul.f32 %v1826_v16, %v1751_v62 }
 0x5d5   :  { %1864 = vst [vmem:[#allocation14 + $0x78] sm:$0xff] %v1848_v56 }
 0x5d6   :  { %1863 = vst [vmem:[#allocation14 + $0x70] sm:$0xff] %v1847_v51 }
 0x5d7   :  { %2484 = shalt.err (!%p2481_p7)
}
 0x5d8   :  { %1876 = dma.vmem_to_hbm [thread:$0]  %s1871_s11, 2048, %s3279_s8, [#allocation11], %s2500_s20, %s2500_s20, %s2501_s21  }
 0x5d9   :  { %2497 = dma.done.wait [#allocation11], 2048  }
 0x5da   :  { %2498 = vsyncadd [#allocation11], 4294965248 }
 0x5db   :  { %1880 = vsyncpa [#allocation10], 1 }
 0x5dc   :  { %1881 = vsyncpa [#allocation13], 1 }
 0x5dd   :  { %1882 = vsyncpa [#allocation11], 1 }

</bundles_post_ra>
